<compile_context>
chip_gen: v7x
topology: tpu7x:2x2x1
jax: 0.10.0
libtpu: 0.0.40
codegen_flags: <defaults>
</compile_context>

<pallas_src>
import functools

import jax
import jax.numpy as jnp
from jax.experimental import pallas as pl
from jax.experimental.pallas import tpu as pltpu

_NEG_BIG = -1e30  # finite "-inf" so masked-row arithmetic never produces NaN


def _reducer_kernel(x_ref, wab_ref, bab_ref, wc_ref, bc_ref, o_ref,
                    m_sc, s_sc, acc_sc, *, n_valid, hidden):
    i = pl.program_id(0)
    tn = x_ref.shape[0]

    @pl.when(i == 0)
    def _init():
        m_sc[...] = jnp.full(m_sc.shape, _NEG_BIG, dtype=m_sc.dtype)
        s_sc[...] = jnp.zeros(s_sc.shape, dtype=s_sc.dtype)
        acc_sc[...] = jnp.zeros(acc_sc.shape, dtype=acc_sc.dtype)

    x = x_ref[...]                                                   # (TN, L) f32

    # ---- fused gated projections: one MXU matmul for both branches ----------
    h = jnp.dot(x, wab_ref[...], preferred_element_type=jnp.float32) + bab_ref[...]
    a = jnp.tanh(h[:, :hidden])                                      # (TN, D)
    b = jax.nn.sigmoid(h[:, hidden:])                                # (TN, D)
    g = a * b                                                        # (TN, D)

    # ---- attention logits ----------------------------------------------------
    logits = jnp.dot(g, wc_ref[...], preferred_element_type=jnp.float32) + bc_ref[...]

    # mask rows past the true sequence length (only the last tile can be partial)
    row = i * tn + jax.lax.broadcasted_iota(jnp.int32, (tn, 1), 0)
    logits = jnp.where(row < n_valid, logits, _NEG_BIG)              # (TN, NC)

    # ---- online softmax over the sequence axis (axis 0), per class ----------
    m_prev = m_sc[...]                                               # (1, NC)
    m_new = jnp.maximum(m_prev, jnp.max(logits, axis=0, keepdims=True))
    alpha = jnp.exp(m_prev - m_new)                                  # (1, NC)
    e = jnp.exp(logits - m_new)                                      # (TN, NC); masked rows -> 0
    s_sc[...] = alpha * s_sc[...] + jnp.sum(e, axis=0, keepdims=True)

    # unnormalized weighted sum: acc(L, NC) = alpha*acc + x^T @ e  (contract over TN)
    part = jax.lax.dot_general(x, e, (((0,), (0,)), ((), ())),
                               preferred_element_type=jnp.float32)   # (L, NC)
    acc_sc[...] = alpha * acc_sc[...] + part
    m_sc[...] = m_new

    @pl.when(i == pl.num_programs(0) - 1)
    def _finalize():
        inv_s = pl.reciprocal(s_sc[...], approx=False)               # (1, NC)
        o_ref[...] = (acc_sc[...] * inv_s).astype(o_ref.dtype)


def attention_gated_sequence_reducer(x, wa, ba, wb, bb, wc, bc, *, tile_n=128):
    """x: (N, embed_dim) f32.  Weights stored (in_dim, out_dim), biases (1, out_dim).
    Returns (n_classes, embed_dim)."""
    n, embed = x.shape
    d = wa.shape[1]
    n_classes = wc.shape[1]

    # Fuse the two gate projections into a single matmul operand.
    w_ab = jnp.concatenate([wa, wb], axis=1)          # (L, 2D)
    b_ab = jnp.concatenate([ba, bb], axis=1)          # (1, 2D)

    n_tiles = pl.cdiv(n, tile_n)
    n_pad = n_tiles * tile_n
    x_p = jnp.pad(x, ((0, n_pad - n), (0, 0))) if n_pad != n else x

    kernel = functools.partial(_reducer_kernel, n_valid=n, hidden=d)

    cost = pl.CostEstimate(
        flops=2 * n * embed * 2 * d + 2 * n * d * n_classes + 2 * n * n_classes * embed,
        transcendentals=n * (2 * d + n_classes),
        bytes_accessed=4 * (n_pad * embed + embed * 2 * d + 2 * d
                            + d * n_classes + n_classes + embed * n_classes),
    )

    out_ln = pl.pallas_call(
        kernel,
        out_shape=jax.ShapeDtypeStruct((embed, n_classes), jnp.float32),
        grid=(n_tiles,),
        in_specs=[
            pl.BlockSpec((tile_n, embed), lambda i: (i, 0)),      # streamed x tiles
            pl.BlockSpec((embed, 2 * d), lambda i: (0, 0)),       # resident fused gate weight
            pl.BlockSpec((1, 2 * d), lambda i: (0, 0)),           # resident fused gate bias
            pl.BlockSpec((d, n_classes), lambda i: (0, 0)),       # resident attention_c weight
            pl.BlockSpec((1, n_classes), lambda i: (0, 0)),       # resident attention_c bias
        ],
        out_specs=pl.BlockSpec((embed, n_classes), lambda i: (0, 0)),
        scratch_shapes=[
            pltpu.VMEM((1, n_classes), jnp.float32),       # running per-class max
            pltpu.VMEM((1, n_classes), jnp.float32),       # running per-class sum
            pltpu.VMEM((embed, n_classes), jnp.float32),   # unnormalized accumulator
        ],
        compiler_params=pltpu.CompilerParams(
            dimension_semantics=("arbitrary",),
            vmem_limit_bytes=32 * 1024 * 1024,
        ),
        cost_estimate=cost,
    )(x_p, w_ab, b_ab, wc, bc)

    # (L, NC) -> (NC, L): pure layout plumbing, done outside the kernel.
    return out_ln.T


def _reference(x, wa, ba, wb, bb, wc, bc):
    hp = jax.lax.Precision.HIGHEST
    a = jnp.tanh(jnp.dot(x, wa, precision=hp) + ba)
    b = jax.nn.sigmoid(jnp.dot(x, wb, precision=hp) + bb)
    A = jnp.dot(a * b, wc, precision=hp) + bc            # (N, n_classes)
    return jnp.dot(jax.nn.softmax(A.T, axis=1), x, precision=hp)   # (n_classes, L)


if __name__ == "__main__":
    # Small synthetic shapes consistent with the module:
    #   sequence length N=200 (exercises the masked partial tile),
    #   embed_dim L=128, gated hidden D=128, output_size (n_classes) = 10.
    N, L, D, NC = 200, 128, 128, 10

    key = jax.random.PRNGKey(0)
    kx, kwa, kba, kwb, kbb, kwc, kbc = jax.random.split(key, 7)

    x = jax.random.normal(kx, (N, L), dtype=jnp.float32)

    # Deterministic parameter init (synthetic; not a checkpoint load).
    # Weights stored as (in_dim, out_dim); biases as (1, out_dim) for 2-D VMEM tiles.
    wa = jax.random.normal(kwa, (L, D), dtype=jnp.float32) * 0.1
    ba = jax.random.normal(kba, (1, D), dtype=jnp.float32) * 0.1
    wb = jax.random.normal(kwb, (L, D), dtype=jnp.float32) * 0.1
    bb = jax.random.normal(kbb, (1, D), dtype=jnp.float32) * 0.1
    wc = jax.random.normal(kwc, (D, NC), dtype=jnp.float32) * 0.1
    bc = jax.random.normal(kbc, (1, NC), dtype=jnp.float32) * 0.1

    out = attention_gated_sequence_reducer(x, wa, ba, wb, bb, wc, bc)
    out = jax.block_until_ready(out)

    ref = _reference(x, wa, ba, wb, bb, wc, bc)
    assert out.shape == (NC, L), out.shape
    err = float(jnp.max(jnp.abs(out - ref)))
    assert jnp.allclose(out, ref, atol=1e-4, rtol=1e-4), f"mismatch vs reference, max_abs_err={err}"

    print("KERNEL_OK")
</pallas_src>

<mosaic_0001>
module attributes {stable_mosaic.version = 11 : i64} {
  func.func @_reducer_kernel(%arg0: i32, %arg1: memref<128x128xf32, #tpu.memory_space<vmem>>, %arg2: memref<128x256xf32, #tpu.memory_space<vmem>>, %arg3: memref<1x256xf32, #tpu.memory_space<vmem>>, %arg4: memref<128x10xf32, #tpu.memory_space<vmem>>, %arg5: memref<1x10xf32, #tpu.memory_space<vmem>>, %arg6: memref<128x10xf32, #tpu.memory_space<vmem>>, %arg7: memref<1x10xf32, #tpu.memory_space<vmem>>, %arg8: memref<1x10xf32, #tpu.memory_space<vmem>>, %arg9: memref<128x10xf32, #tpu.memory_space<vmem>>) attributes {dimension_semantics = [#tpu.dimension_semantics<arbitrary>], iteration_bounds = array<i64: 2>, scalar_prefetch = 0 : i64, scratch_operands = 3 : i64, tpu.core_type = #tpu.core_type<tc>, window_params = [{transform_indices = @transform_0, window_bounds = array<i64: 128, 128>}, {pipeline_mode = #tpu.pipeline_mode<synchronous>, transform_indices = @transform_1, window_bounds = array<i64: 128, 256>}, {pipeline_mode = #tpu.pipeline_mode<synchronous>, transform_indices = @transform_2, window_bounds = array<i64: 1, 256>}, {pipeline_mode = #tpu.pipeline_mode<synchronous>, transform_indices = @transform_3, window_bounds = array<i64: 128, 10>}, {pipeline_mode = #tpu.pipeline_mode<synchronous>, transform_indices = @transform_4, window_bounds = array<i64: 1, 10>}, {pipeline_mode = #tpu.pipeline_mode<synchronous>, transform_indices = @transform_5, window_bounds = array<i64: 128, 10>}]} {
    %c0_i32 = arith.constant 0 : i32
    %0 = arith.cmpi eq, %arg0, %c0_i32 : i32
    %1 = arith.extui %0 : i1 to i32
    %c0_i32_0 = arith.constant 0 : i32
    %2 = arith.cmpi ne, %1, %c0_i32_0 : i32
    scf.if %2 {
      %cst_29 = arith.constant -1.000000e+30 : f32
      %58 = vector.broadcast %cst_29 : f32 to vector<1x10xf32>
      %c0_30 = arith.constant 0 : index
      %c0_31 = arith.constant 0 : index
      %59 = vector.load %arg7[%c0_30, %c0_31] : memref<1x10xf32, #tpu.memory_space<vmem>>, vector<1x10xf32>
      tpu.vector_store %arg7[%c0_30, %c0_31], %58 {strides = array<i32>} : memref<1x10xf32, #tpu.memory_space<vmem>>, vector<1x10xf32>,
      %cst_32 = arith.constant 0.000000e+00 : f32
      %60 = vector.broadcast %cst_32 : f32 to vector<1x10xf32>
      %c0_33 = arith.constant 0 : index
      %c0_34 = arith.constant 0 : index
      %61 = vector.load %arg8[%c0_33, %c0_34] : memref<1x10xf32, #tpu.memory_space<vmem>>, vector<1x10xf32>
      tpu.vector_store %arg8[%c0_33, %c0_34], %60 {strides = array<i32>} : memref<1x10xf32, #tpu.memory_space<vmem>>, vector<1x10xf32>,
      %cst_35 = arith.constant 0.000000e+00 : f32
      %62 = vector.broadcast %cst_35 : f32 to vector<128x10xf32>
      %c0_36 = arith.constant 0 : index
      %c0_37 = arith.constant 0 : index
      %63 = vector.load %arg9[%c0_36, %c0_37] : memref<128x10xf32, #tpu.memory_space<vmem>>, vector<128x10xf32>
      tpu.vector_store %arg9[%c0_36, %c0_37], %62 {strides = array<i32>} : memref<128x10xf32, #tpu.memory_space<vmem>>, vector<128x10xf32>,
    } else {
    }
    %c0 = arith.constant 0 : index
    %c0_1 = arith.constant 0 : index
    %3 = vector.load %arg1[%c0, %c0_1] : memref<128x128xf32, #tpu.memory_space<vmem>>, vector<128x128xf32>
    %c0_2 = arith.constant 0 : index
    %c0_3 = arith.constant 0 : index
    %4 = vector.load %arg2[%c0_2, %c0_3] : memref<128x256xf32, #tpu.memory_space<vmem>>, vector<128x256xf32>
    %cst = arith.constant dense<0.000000e+00> : vector<128x256xf32>
    %5 = tpu.matmul %3, %4, %cst {dimension_numbers = #tpu.dot_dimension_numbers<[1], [0], [0], [1], [0, 0, 1, 1], [], []>} : vector<128x128xf32>, vector<128x256xf32>, vector<128x256xf32> -> vector<128x256xf32>
    %c0_4 = arith.constant 0 : index
    %c0_5 = arith.constant 0 : index
    %6 = vector.load %arg3[%c0_4, %c0_5] : memref<1x256xf32, #tpu.memory_space<vmem>>, vector<1x256xf32>
    %7 = vector.broadcast %6 : vector<1x256xf32> to vector<128x256xf32>
    %8 = arith.addf %5, %7 : vector<128x256xf32>
    %9 = vector.extract_strided_slice %8 {offsets = [0, 0], sizes = [128, 128], strides = [1, 1]} : vector<128x256xf32> to vector<128x128xf32>
    %10 = math.tanh %9 : vector<128x128xf32>
    %11 = vector.extract_strided_slice %8 {offsets = [0, 128], sizes = [128, 128], strides = [1, 1]} : vector<128x256xf32> to vector<128x128xf32>
    %12 = arith.negf %11 : vector<128x128xf32>
    %13 = math.exp %12 : vector<128x128xf32>
    %cst_6 = arith.constant 1.000000e+00 : f32
    %14 = vector.broadcast %cst_6 : f32 to vector<128x128xf32>
    %15 = arith.addf %14, %13 : vector<128x128xf32>
    %16 = arith.divf %14, %15 : vector<128x128xf32>
    %17 = arith.mulf %10, %16 : vector<128x128xf32>
    %c0_7 = arith.constant 0 : index
    %c0_8 = arith.constant 0 : index
    %18 = vector.load %arg4[%c0_7, %c0_8] : memref<128x10xf32, #tpu.memory_space<vmem>>, vector<128x10xf32>
    %cst_9 = arith.constant dense<0.000000e+00> : vector<128x10xf32>
    %19 = tpu.matmul %17, %18, %cst_9 {dimension_numbers = #tpu.dot_dimension_numbers<[1], [0], [0], [1], [0, 0, 1, 1], [], []>} : vector<128x128xf32>, vector<128x10xf32>, vector<128x10xf32> -> vector<128x10xf32>
    %c0_10 = arith.constant 0 : index
    %c0_11 = arith.constant 0 : index
    %20 = vector.load %arg5[%c0_10, %c0_11] : memref<1x10xf32, #tpu.memory_space<vmem>>, vector<1x10xf32>
    %21 = vector.broadcast %20 : vector<1x10xf32> to vector<128x10xf32>
    %22 = arith.addf %19, %21 : vector<128x10xf32>
    %c128_i32 = arith.constant 128 : i32
    %23 = arith.muli %arg0, %c128_i32 : i32
    %24 = tpu.iota {dimensions = array<i32: 0>} : vector<128x1xi32>
    %25 = vector.broadcast %23 : i32 to vector<128x1xi32>
    %26 = arith.addi %25, %24 : vector<128x1xi32>
    %c200_i32 = arith.constant 200 : i32
    %27 = vector.broadcast %c200_i32 : i32 to vector<128x1xi32>
    %28 = arith.cmpi slt, %26, %27 : vector<128x1xi32>
    %cst_12 = arith.constant -1.000000e+30 : f32
    %29 = vector.shape_cast %28 : vector<128x1xi1> to vector<128x1xi1>
    %30 = vector.broadcast %29 : vector<128x1xi1> to vector<128x10xi1>
    %31 = vector.broadcast %cst_12 : f32 to vector<128x10xf32>
    %32 = arith.select %30, %22, %31 : vector<128x10xi1>, vector<128x10xf32>
    %c0_13 = arith.constant 0 : index
    %c0_14 = arith.constant 0 : index
    %33 = vector.load %arg7[%c0_13, %c0_14] : memref<1x10xf32, #tpu.memory_space<vmem>>, vector<1x10xf32>
    %cst_15 = arith.constant dense<0xFF800000> : vector<10xf32>
    %34 = vector.multi_reduction <maximumf>, %32, %cst_15 [0] : vector<128x10xf32> to vector<10xf32>
    %35 = vector.shape_cast %34 : vector<10xf32> to vector<1x10xf32>
    %36 = arith.maximumf %33, %35 : vector<1x10xf32>
    %37 = arith.subf %33, %36 : vector<1x10xf32>
    %38 = math.exp %37 : vector<1x10xf32>
    %39 = vector.broadcast %36 : vector<1x10xf32> to vector<128x10xf32>
    %40 = arith.subf %32, %39 : vector<128x10xf32>
    %41 = math.exp %40 : vector<128x10xf32>
    %c0_16 = arith.constant 0 : index
    %c0_17 = arith.constant 0 : index
    %42 = vector.load %arg8[%c0_16, %c0_17] : memref<1x10xf32, #tpu.memory_space<vmem>>, vector<1x10xf32>
    %43 = arith.mulf %38, %42 : vector<1x10xf32>
    %cst_18 = arith.constant dense<0.000000e+00> : vector<10xf32>
    %44 = vector.multi_reduction <add>, %41, %cst_18 [0] : vector<128x10xf32> to vector<10xf32>
    %45 = vector.shape_cast %44 : vector<10xf32> to vector<1x10xf32>
    %46 = arith.addf %43, %45 : vector<1x10xf32>
    %c0_19 = arith.constant 0 : index
    %c0_20 = arith.constant 0 : index
    %47 = vector.load %arg8[%c0_19, %c0_20] : memref<1x10xf32, #tpu.memory_space<vmem>>, vector<1x10xf32>
    tpu.vector_store %arg8[%c0_19, %c0_20], %46 {strides = array<i32>} : memref<1x10xf32, #tpu.memory_space<vmem>>, vector<1x10xf32>,
    %cst_21 = arith.constant dense<0.000000e+00> : vector<128x10xf32>
    %48 = tpu.matmul %3, %41, %cst_21 {dimension_numbers = #tpu.dot_dimension_numbers<[0], [0], [1], [1], [0, 1, 1, 1], [], []>} : vector<128x128xf32>, vector<128x10xf32>, vector<128x10xf32> -> vector<128x10xf32>
    %c0_22 = arith.constant 0 : index
    %c0_23 = arith.constant 0 : index
    %49 = vector.load %arg9[%c0_22, %c0_23] : memref<128x10xf32, #tpu.memory_space<vmem>>, vector<128x10xf32>
    %50 = vector.broadcast %38 : vector<1x10xf32> to vector<128x10xf32>
    %51 = arith.mulf %50, %49 : vector<128x10xf32>
    %52 = arith.addf %51, %48 : vector<128x10xf32>
    %c0_24 = arith.constant 0 : index
    %c0_25 = arith.constant 0 : index
    %53 = vector.load %arg9[%c0_24, %c0_25] : memref<128x10xf32, #tpu.memory_space<vmem>>, vector<128x10xf32>
    tpu.vector_store %arg9[%c0_24, %c0_25], %52 {strides = array<i32>} : memref<128x10xf32, #tpu.memory_space<vmem>>, vector<128x10xf32>,
    %c0_26 = arith.constant 0 : index
    %c0_27 = arith.constant 0 : index
    %54 = vector.load %arg7[%c0_26, %c0_27] : memref<1x10xf32, #tpu.memory_space<vmem>>, vector<1x10xf32>
    tpu.vector_store %arg7[%c0_26, %c0_27], %36 {strides = array<i32>} : memref<1x10xf32, #tpu.memory_space<vmem>>, vector<1x10xf32>,
    %c1_i32 = arith.constant 1 : i32
    %55 = arith.cmpi eq, %arg0, %c1_i32 : i32
    %56 = arith.extui %55 : i1 to i32
    %c0_i32_28 = arith.constant 0 : i32
    %57 = arith.cmpi ne, %56, %c0_i32_28 : i32
    scf.if %57 {
      %c0_29 = arith.constant 0 : index
      %c0_30 = arith.constant 0 : index
      %58 = vector.load %arg8[%c0_29, %c0_30] : memref<1x10xf32, #tpu.memory_space<vmem>>, vector<1x10xf32>
      %59 = tpu.reciprocal %58 : vector<1x10xf32> -> vector<1x10xf32>
      %c0_31 = arith.constant 0 : index
      %c0_32 = arith.constant 0 : index
      %60 = vector.load %arg9[%c0_31, %c0_32] : memref<128x10xf32, #tpu.memory_space<vmem>>, vector<128x10xf32>
      %61 = vector.broadcast %59 : vector<1x10xf32> to vector<128x10xf32>
      %62 = arith.mulf %60, %61 : vector<128x10xf32>
      %c0_33 = arith.constant 0 : index
      %c0_34 = arith.constant 0 : index
      %63 = vector.load %arg6[%c0_33, %c0_34] : memref<128x10xf32, #tpu.memory_space<vmem>>, vector<128x10xf32>
      tpu.vector_store %arg6[%c0_33, %c0_34], %62 {strides = array<i32>} : memref<128x10xf32, #tpu.memory_space<vmem>>, vector<128x10xf32>,
    } else {
    }
    return
  }
  func.func @transform_0(%arg0: i32) -> (i32, i32) {
    %c0_i32 = arith.constant 0 : i32
    %c0_i32_0 = arith.constant 0 : i32
    return %arg0, %c0_i32 : i32, i32
  }
  func.func @transform_1(%arg0: i32) -> (i32, i32) {
    %c0_i32 = arith.constant 0 : i32
    %c0_i32_0 = arith.constant 0 : i32
    %c0_i32_1 = arith.constant 0 : i32
    return %c0_i32, %c0_i32_0 : i32, i32
  }
  func.func @transform_2(%arg0: i32) -> (i32, i32) {
    %c0_i32 = arith.constant 0 : i32
    %c0_i32_0 = arith.constant 0 : i32
    %c0_i32_1 = arith.constant 0 : i32
    return %c0_i32, %c0_i32_0 : i32, i32
  }
  func.func @transform_3(%arg0: i32) -> (i32, i32) {
    %c0_i32 = arith.constant 0 : i32
    %c0_i32_0 = arith.constant 0 : i32
    %c0_i32_1 = arith.constant 0 : i32
    return %c0_i32, %c0_i32_0 : i32, i32
  }
  func.func @transform_4(%arg0: i32) -> (i32, i32) {
    %c0_i32 = arith.constant 0 : i32
    %c0_i32_0 = arith.constant 0 : i32
    %c0_i32_1 = arith.constant 0 : i32
    return %c0_i32, %c0_i32_0 : i32, i32
  }
  func.func @transform_5(%arg0: i32) -> (i32, i32) {
    %c0_i32 = arith.constant 0 : i32
    %c0_i32_0 = arith.constant 0 : i32
    %c0_i32_1 = arith.constant 0 : i32
    return %c0_i32, %c0_i32_0 : i32, i32
  }
}

</mosaic_0001>

<bundles_post_ra>
// kernel: tpu_custom_call.1
= control target key start
LH: loop header
LB: loop body
LE: loop exit
PB: predicated region body
PF: predicated region fallthrough
CT: control target
= control target key end

     0   :  { %10 = vsyncpa [#allocation6], 0  ;;  %s2580_s0 = inlined_call_operand.hbm [shape: f32[256,128], index: 0, kind: input, shape index: {}]   ;;  %s2581_s1 = inlined_call_operand.hbm [shape: f32[128,256], index: 1, kind: input, shape index: {}]   ;;  %s2582_s2 = inlined_call_operand.vmem [shape: f32[1,256], index: 2, kind: input, shape index: {}]   ;;  %s2583_s3 = inlined_call_operand.vmem [shape: f32[128,10], index: 3, kind: input, shape index: {}]   ;;  %s2584_s4 = inlined_call_operand.vmem [shape: f32[1,10], index: 4, kind: input, shape index: {}]   ;;  %s2585_s5 = inlined_call_operand.vmem [shape: f32[128,10], index: 5, kind: output, shape index: {}]  }
   0x1   :  { %12 = vsyncpa [#allocation6 + $0x1], 0 }
   0x2   :  { %13 = vsyncpa [#allocation8], 0  ;;  %s2013_s18 = smov 0   ;;  %s2015_s19 = smov 0  }
   0x3   :  { %s2017_s20 = smov 0   ;;  %s2019_s21 = smov 0  }
   0x4 LB: > { %s2032_s22 = sadd.s32 4294967295, %s1972_s21   ;;  %p39_p0 = scmp.ne.s32.totalorder %s1964_s19, %s1960_s18  ;;  %s1972_s21 = sphi %s2019_s21, %s2602_s21   ;;  %s1968_s20 = sphi %s2017_s20, %s2601_s20   ;;  %s1964_s19 = sphi %s2015_s19, %s2600_s19   ;;  %s1960_s18 = sphi %s2013_s18, %s2599_s18  }
   0x5   : > { %p2586_p1 = scmp.eq.s32.totalorder %s2032_s22, 0  ;;  %p1383_p2 = scmp.ge.s32.totalorder %s1972_s21, 1 }
   0x6   : > { %p155_p3 = scmp.lt.s32.totalorder %s1972_s21, 3  ;;  %s1974_s25 = smov [#allocation7]  }
   0x7   : > { %p2041_p5 = por %p2586_p1, %p39_p0  ;;  %s167_s26 = sshll.u32 %s1974_s25, 4  ;;  %s168_s26 = int_to_ptr.vmem [resolvable:$true] %s167_s26 }
   0x8   : > { %p2045_p6 = pnand %p1383_p2, %p155_p3  ;;  %s2058_s28 = sadd.s32 1, %s1972_s21  }
   0x9   : > { %s2589_s23 = scalar_select %p2041_p5, 1, 0 }
   0xa   : > { %s2590_s24 = scalar_select %p2045_p6, 1, 0 }
   0xb   : > { %p1693_p7 = pneg %p2045_p6  ;;  %s26_s29 = sadd.s32 1, %s1968_s20 }
   0xc   : > { %s23_s30 = ssub.s32 %s1972_s21, %s2058_s28  ;;  %s1876_s8 = scalar_lea.hbm %s2581_s1, 4096 }
   0xd   : > { %p2053_p8 = pnand %p1693_p7, %p2586_p1  ;;  %p1877_p9 = scmp.ne.s32.totalorder %s2581_s1, %s1876_s8 }
   0xe   : > { %p1883_p13 = scmp.lt.u32.totalorder %s1876_s8, %s2581_s1 }
   0xf   : > { %p1878_p10 = pneg %p2053_p8 }
  0x11   : > { %p1879_p11 = pnand %p1878_p10, %p1877_p9 }
  0x13   : > { %p1880_p12 = pneg %p1879_p11 }
  0x15   : > { %p1885_p0 = pnand %p1883_p13, %p1880_p12 }
  0x17   : > { %1888 = shalt.err (!%p1885_p0)
}
  0x18   : > { %s1889_s13 = scalar_lea.vmem %s168_s26, 4096  ;;  %p1897_p4 = scmp.lt.s32.totalorder %s168_s26, %s168_s26 }
  0x19   : > { %p1890_p2 = scmp.ne.s32.totalorder %s168_s26, %s1889_s13  ;;  %p1898_p1 = scmp.lt.s32.totalorder %s1889_s13, %s1889_s13 }
  0x1b   : > { %p1892_p3 = pnand %p1890_p2, %p1878_p10  ;;  %p1899_p5 = por %p1898_p1, %p1897_p4 }
  0x1d   : > { %p1893_p7 = pneg %p1892_p3 }
  0x1f   : > { %p1900_p6 = pnand %p1899_p5, %p1893_p7 }
  0x21   : > { %1903 = shalt.err (!%p1900_p6)
}
  0x22   : > { %s1975_s14 = smov 256   ;;  %s1976_s15 = smov 16  }
  0x23   : > { %1696 = dma.hbm_to_vmem [thread:$0]  (!%p2053_p8), %s2581_s1, 4096, %s168_s26, [#allocation8], %s1975_s14, %s1975_s14, %s1976_s15  }
  0x24   : > { %p24_p9 = scmp.eq.s32.totalorder %s23_s30, 0  ;;  %p33_p10 = scmp.ne.s32.totalorder %s1968_s20, %s1964_s19 }
  0x25   : > { %p34_p1 = scmp.eq.s32.totalorder %s1972_s21, 0  ;;  %p1702_p4 = scmp.lt.s32.totalorder %s1972_s21, 2 }
  0x26   : > { %s2084_s18 = scalar_select %p24_p9, %s1968_s20, %s26_s29  }
  0x27   : > { %p35_p5 = por %p34_p1, %p33_p10  ;;  %s190_s25 = sand.u32 1, %s1968_s20  }
  0x28   : > { %s1386_s6 = sshll.u32 %s190_s25, 7  ;;  %s1414_s7 = sshll.u32 %s1972_s21, 11 }
  0x29   : > { %s2091_s10 = scalar_lea.hbm %s2580_s0, %s1414_s7  ;;  %s194_s26 = scalar_lea.vmem [#allocation5], %s1386_s6 }
  0x2a   : > { %s201_s27 = sshll.u32 %s194_s26, 4  ;;  %p2095_p6 = pnand %p1702_p4, %p35_p5  ;;  %s2093_s27 = int_to_ptr.vmem [resolvable:$true] %s201_s27 }
  0x2b   : > { %s2099_s21 = scalar_lea.sflag [#allocation6], %s190_s25  ;;  %s1904_s30 = scalar_lea.hbm %s2091_s10, 2048 }
  0x2c   : > { %p1905_p8 = scmp.ne.s32.totalorder %s2091_s10, %s1904_s30  ;;  %p1906_p11 = pneg %p2095_p6 }
  0x2d   : > { %s1909_s13 = scalar_lea.hbm %s2580_s0, 4096  ;;  %p1910_p0 = scmp.lt.u32.totalorder %s2091_s10, %s2580_s0 }
  0x2e   : > { %p1907_p12 = pnand %p1906_p11, %p1905_p8  ;;  %p1911_p2 = scmp.lt.u32.totalorder %s1909_s13, %s1904_s30 }
  0x2f   : > { %p1913_p7 = scmp.lt.u32.totalorder %s1904_s30, %s2091_s10 }
  0x30   : > { %p1908_p13 = pneg %p1907_p12  ;;  %p1912_p3 = por %p1911_p2, %p1910_p0 }
  0x32   : > { %p1914_p9 = por %p1913_p7, %p1912_p3 }
  0x34   : > { %p1915_p10 = pnand %p1914_p9, %p1908_p13 }
  0x36   : > { %1918 = shalt.err (!%p1915_p10)
}
  0x37   : > { %s1919_s16 = scalar_lea.vmem %s2093_s27, 2048  ;;  %s1977_s17 = smov [#allocation5]  }
  0x38   : > { %p1920_p1 = scmp.ne.s32.totalorder %s2093_s27, %s1919_s16  ;;  %s1924_s25 = sshll.u32 %s1977_s17, 4  ;;  %s1925_s25 = int_to_ptr.vmem [resolvable:$false] %s1924_s25 }
  0x39   : > { %s1926_s6 = scalar_lea.vmem %s1925_s25, 4096  ;;  %p1927_p8 = scmp.lt.s32.totalorder %s2093_s27, %s1925_s25 }
  0x3a   : > { %p1922_p4 = pnand %p1920_p1, %p1906_p11  ;;  %p1928_p12 = scmp.lt.s32.totalorder %s1926_s6, %s1919_s16 }
  0x3c   : > { %p1923_p5 = pneg %p1922_p4  ;;  %p1929_p0 = por %p1928_p12, %p1927_p8 }
  0x3e   : > { %p1930_p2 = pnand %p1929_p0, %p1923_p5 }
  0x40   : > { %1933 = shalt.err (!%p1930_p2)
}
  0x41   : > { %s1978_s7 = smov 128   ;;  %s1979_s8 = smov 8  }
  0x42   : > { %1700 = dma.hbm_to_vmem [thread:$0]  (!%p2095_p6), %s2091_s10, 2048, %s2093_s27, %s2099_s21, %s1978_s7, %s1978_s7, %s1979_s8  }
  0x43   : > { %p2593_p11 = scmp.ne.s32.totalorder %s2590_s24, 0 }
  0x44   : > { %s215_s9 = sand.u32 (!%p2593_p11), 1, %s1964_s19   ;;  %p2594_p13 = scmp.ne.s32.totalorder (!%p2593_p11), %s2589_s23, 0 }
  0x45   : > { %213 = sbr.rel (%p2593_p11) target bundleno = 974 (0x3ce), region = 40  ;;  %s1390_s26 = sshll.u32 (!%p2593_p11), %s215_s9, 7 }
  0x46   : > { %s216_s30 = scalar_lea.sflag (!%p2593_p11), [#allocation6], %s215_s9  ;;  %s2130_s11 = scalar_lea.vmem (!%p2593_p11), [#allocation5], %s1390_s26 }
  0x4c   : > { %1951 = dma.done.wait (%p2594_p13), %s216_s30, 2048  }
  0x4d   : > { %1953 = vsyncadd (%p2594_p13), %s216_s30, 4294965248  ;;  %p2595_p3 = scmp.eq.s32.totalorder %s2032_s22, 0 }
  0x4f   : > { %1955 = dma.done.wait (%p2595_p3), [#allocation8], 4096   ;;  %p2596_p6 = pmov %p2595_p3 }
  0x50   : > { %p2597_p7 = scmp.ne.s32.totalorder %s2032_s22, 0 }
  0x51   : > { %1957 = vsyncadd (%p2596_p6), [#allocation8], 4294963200  ;;  %vm250_vm0 = vcmask (!%p2597_p7), 73728   ;;  %vm253_vm1 = vcmask (!%p2597_p7), 80896   ;;  %v1980_v0 = vmov (!%p2597_p7), -1e+30  }
  0x52   : > { %249 = sbr.rel (%p2597_p7) target bundleno = 92 (0x5c), region = 52  ;;  %251 = vst.msk [vmem:[#allocation2] sm:$0x1] (!%p2597_p7), %vm250_vm0, %v1980_v0  ;;  %v1981_v1 = vmov (!%p2597_p7), 0.0  }
  0x53   : > { %252 = vst.msk [vmem:[#allocation3] sm:$0x1] (!%p2597_p7), %vm250_vm0, %v1981_v1 }
  0x54   : > { %254 = vst.msk [vmem:[#allocation4] sm:$0xff] (!%p2597_p7), %vm253_vm1, %v1981_v1  ;;  %255 = vst.msk [vmem:[#allocation4 + $0x8] sm:$0xff] (!%p2597_p7), %vm253_vm1, %v1981_v1 }
  0x55   : > { %256 = vst.msk [vmem:[#allocation4 + $0x10] sm:$0xff] (!%p2597_p7), %vm253_vm1, %v1981_v1  ;;  %257 = vst.msk [vmem:[#allocation4 + $0x18] sm:$0xff] (!%p2597_p7), %vm253_vm1, %v1981_v1 }
  0x56   : > { %258 = vst.msk [vmem:[#allocation4 + $0x20] sm:$0xff] (!%p2597_p7), %vm253_vm1, %v1981_v1  ;;  %259 = vst.msk [vmem:[#allocation4 + $0x28] sm:$0xff] (!%p2597_p7), %vm253_vm1, %v1981_v1 }
  0x57   : > { %260 = vst.msk [vmem:[#allocation4 + $0x30] sm:$0xff] (!%p2597_p7), %vm253_vm1, %v1981_v1  ;;  %261 = vst.msk [vmem:[#allocation4 + $0x38] sm:$0xff] (!%p2597_p7), %vm253_vm1, %v1981_v1 }
  0x58   : > { %262 = vst.msk [vmem:[#allocation4 + $0x40] sm:$0xff] (!%p2597_p7), %vm253_vm1, %v1981_v1  ;;  %263 = vst.msk [vmem:[#allocation4 + $0x48] sm:$0xff] (!%p2597_p7), %vm253_vm1, %v1981_v1 }
  0x59   : > { %264 = vst.msk [vmem:[#allocation4 + $0x50] sm:$0xff] %vm253_vm1, %v1981_v1  ;;  %265 = vst.msk [vmem:[#allocation4 + $0x58] sm:$0xff] %vm253_vm1, %v1981_v1 }
  0x5a   : > { %266 = vst.msk [vmem:[#allocation4 + $0x60] sm:$0xff] %vm253_vm1, %v1981_v1  ;;  %267 = vst.msk [vmem:[#allocation4 + $0x68] sm:$0xff] %vm253_vm1, %v1981_v1 }
  0x5b   : > { %268 = vst.msk [vmem:[#allocation4 + $0x70] sm:$0xff] %vm253_vm1, %v1981_v1  ;;  %269 = vst.msk [vmem:[#allocation4 + $0x78] sm:$0xff] %vm253_vm1, %v1981_v1 }
  0x5c PF: > { %v287_v2 = vld [vmem:[#allocation7 + $0x8] sm:$0xff]  ;;  %v289_v3 = vld [vmem:[#allocation7 + $0x18] sm:$0xff]  ;;  %v286_v4 = vld [vmem:[#allocation7] sm:$0xff]  ;;  %v1982_v9 = vmov 0.0   ;;  %s1410_s7 = sshll.u32 %s2032_s22, 7  ;;  %vm887_vm5 = vcmask 80896  }
  0x5d   : > { %v1591_v5 = vpack.c.bf16 %v289_v3, %v287_v2  ;;  %v288_v6 = vld [vmem:[#allocation7 + $0x10] sm:$0xff]  ;;  %v291_v7 = vld [vmem:[#allocation7 + $0x28] sm:$0xff]  ;;  %v293_v8 = vld [vmem:[#allocation7 + $0x38] sm:$0xff]  ;;  %394 = vmatprep.mubr.f32.mxu0 %v1982_v9  ;;  %p1411_p9 = scmp.ne.s32.totalorder %s2032_s22, 1 }
  0x5e   : > { %v1593_v10 = vpack.c.bf16 %v288_v6, %v286_v4  ;;  %v1595_v11 = vpack.c.bf16 %v293_v8, %v291_v7  ;;  %v290_v12 = vld [vmem:[#allocation7 + $0x20] sm:$0xff]  ;;  %v292_v13 = vld [vmem:[#allocation7 + $0x30] sm:$0xff]  ;;  %v295_v14 = vld [vmem:[#allocation7 + $0x48] sm:$0xff] }
  0x5f   : > { %1592 = vmatprep.subr.bf16.mxu0 %v1591_v5  ;;  %v297_v15 = vld [vmem:[#allocation7 + $0x58] sm:$0xff]  ;;  %v1597_v16 = vpack.c.bf16 %v292_v13, %v290_v12  ;;  %v294_v18 = vld [vmem:[#allocation7 + $0x40] sm:$0xff]  ;;  %v296_v19 = vld [vmem:[#allocation7 + $0x50] sm:$0xff] }
  0x60   : > { %1594 = vmatpush1.bf16.msra.mxu0 %v1593_v10  ;;  %v1599_v17 = vpack.c.bf16 %v297_v15, %v295_v14  ;;  %v299_v20 = vld [vmem:[#allocation7 + $0x68] sm:$0xff]  ;;  %v301_v21 = vld [vmem:[#allocation7 + $0x78] sm:$0xff]  ;;  %v1601_v22 = vpack.c.bf16 %v296_v19, %v294_v18  ;;  %v298_v24 = vld [vmem:[#allocation7 + $0x60] sm:$0xff] }
  0x61   : > { %1596 = vmatprep.subr.bf16.mxu0 %v1595_v11  ;;  %v1603_v23 = vpack.c.bf16 %v301_v21, %v299_v20  ;;  %v300_v25 = vld [vmem:[#allocation7 + $0x70] sm:$0xff]  ;;  %v303_v26 = vld [vmem:[#allocation7 + $0x88] sm:$0xff]  ;;  %v305_v27 = vld [vmem:[#allocation7 + $0x98] sm:$0xff] }
  0x62   : > { %v270_v28 = vld [vmem:[%s2130_s11] sm:$0xff]  ;;  %v1605_v29 = vpack.c.bf16 %v300_v25, %v298_v24  ;;  %v1607_v30 = vpack.c.bf16 %v305_v27, %v303_v26  ;;  %v304_v32 = vld [vmem:[#allocation7 + $0x90] sm:$0xff]  ;;  %v307_v33 = vld [vmem:[#allocation7 + $0xa8] sm:$0xff]  ;;  %v320_v27 = vlaneseq }
  0x63   : > { %1025 = vxpose.xlu0.b32.start [1/16] %v270_v28, 128  ;;  %v302_v31 = vld [vmem:[#allocation7 + $0x80] sm:$0xff]  ;;  %v309_v34 = vld [vmem:[#allocation7 + $0xb8] sm:$0xff]  ;;  %v271_v35 = vld [vmem:[%s2130_s11 + $0x8] sm:$0xff] }
  0x64   : > { %1598 = vmatpush1.bf16.msra.mxu0 %v1597_v16  ;;  %v1609_v36 = vpack.c.bf16 %v304_v32, %v302_v31  ;;  %v1611_v37 = vpack.c.bf16 %v309_v34, %v307_v33  ;;  %v306_v38 = vld [vmem:[#allocation7 + $0xa0] sm:$0xff]  ;;  %v308_v39 = vld [vmem:[#allocation7 + $0xb0] sm:$0xff]  ;;  %v311_v40 = vld [vmem:[#allocation7 + $0xc8] sm:$0xff] }
  0x65   : > { %1600 = vmatprep.subr.bf16.mxu0 %v1599_v17  ;;  %v313_v41 = vld [vmem:[#allocation7 + $0xd8] sm:$0xff]  ;;  %v272_v42 = vld [vmem:[%s2130_s11 + $0x10] sm:$0xff]  ;;  %v1613_v43 = vpack.c.bf16 %v308_v39, %v306_v38  ;;  %v310_v45 = vld [vmem:[#allocation7 + $0xc0] sm:$0xff] }
  0x66   : > { %v1615_v44 = vpack.c.bf16 %v313_v41, %v311_v40  ;;  %v312_v46 = vld [vmem:[#allocation7 + $0xd0] sm:$0xff]  ;;  %v315_v47 = vld [vmem:[#allocation7 + $0xe8] sm:$0xff]  ;;  %v317_v48 = vld [vmem:[#allocation7 + $0xf8] sm:$0xff] }
  0x67   : > { %1026 = vxpose.xlu0.b32.cont [2/16] %v271_v35, 128  ;;  %v273_v49 = vld [vmem:[%s2130_s11 + $0x18] sm:$0xff]  ;;  %v1617_v50 = vpack.c.bf16 %v312_v46, %v310_v45  ;;  %v1619_v51 = vpack.c.bf16 %v317_v48, %v315_v47  ;;  %v314_v52 = vld [vmem:[#allocation7 + $0xe0] sm:$0xff]  ;;  %v316_v53 = vld [vmem:[#allocation7 + $0xf0] sm:$0xff] }
  0x68   : > { %1602 = vmatpush1.bf16.msra.mxu0 %v1601_v22  ;;  %v274_v54 = vld [vmem:[%s2130_s11 + $0x20] sm:$0xff]  ;;  %v1621_v55 = vpack.c.bf16 %v316_v53, %v314_v52  ;;  %v275_v56 = vld [vmem:[%s2130_s11 + $0x28] sm:$0xff]  ;;  %v276_v57 = vld [vmem:[%s2130_s11 + $0x30] sm:$0xff] }
  0x69   : > { %1604 = vmatprep.subr.bf16.mxu0 %v1603_v23  ;;  %v277_v58 = vld [vmem:[%s2130_s11 + $0x38] sm:$0xff]  ;;  %v278_v59 = vld [vmem:[%s2130_s11 + $0x40] sm:$0xff]  ;;  %v279_v60 = vld [vmem:[%s2130_s11 + $0x48] sm:$0xff] }
  0x6a   : > { %v280_v61 = vld [vmem:[%s2130_s11 + $0x50] sm:$0xff]  ;;  %v281_v62 = vld [vmem:[%s2130_s11 + $0x58] sm:$0xff]  ;;  %v282_v63 = vld [vmem:[%s2130_s11 + $0x60] sm:$0xff] }
  0x6b   : > { %1027 = vxpose.xlu0.b32.cont [3/16] %v272_v42, 128  ;;  %v283_v0 = vld [vmem:[%s2130_s11 + $0x68] sm:$0xff]  ;;  %v284_v1 = vld [vmem:[%s2130_s11 + $0x70] sm:$0xff]  ;;  %v285_v2 = vld [vmem:[%s2130_s11 + $0x78] sm:$0xff] }
  0x6c   : > { %1606 = vmatpush1.bf16.msra.mxu0 %v1605_v29  ;;  %v619_v3 = vld [vmem:[%s2583_s3] sm:$0xff]  ;;  %v620_v4 = vld [vmem:[%s2583_s3 + $0x8] sm:$0xff]  ;;  %v621_v6 = vld [vmem:[%s2583_s3 + $0x10] sm:$0xff] }
  0x6d   : > { %1608 = vmatprep.subr.bf16.mxu0 %v1607_v30  ;;  %v1623_v5 = vpack.c.bf16 %v620_v4, %v619_v3  ;;  %v622_v7 = vld [vmem:[%s2583_s3 + $0x18] sm:$0xff]  ;;  %v624_v10 = vld [vmem:[%s2583_s3 + $0x28] sm:$0xff]  ;;  %v625_v12 = vld [vmem:[%s2583_s3 + $0x30] sm:$0xff] }
  0x6e   : > { %v1627_v8 = vpack.c.bf16 %v622_v7, %v621_v6  ;;  %v626_v13 = vld [vmem:[%s2583_s3 + $0x38] sm:$0xff]  ;;  %v627_v15 = vld [vmem:[%s2583_s3 + $0x40] sm:$0xff]  ;;  %v628_v16 = vld [vmem:[%s2583_s3 + $0x48] sm:$0xff] }
  0x6f   : > { %1028 = vxpose.xlu0.b32.cont [4/16] %v273_v49, 128  ;;  %1624 = vmatprep.subr.bf16.mxu1 %v1623_v5  ;;  %v1635_v14 = vpack.c.bf16 %v626_v13, %v625_v12  ;;  %v1639_v17 = vpack.c.bf16 %v628_v16, %v627_v15  ;;  %v629_v18 = vld [vmem:[%s2583_s3 + $0x50] sm:$0xff]  ;;  %v630_v19 = vld [vmem:[%s2583_s3 + $0x58] sm:$0xff]  ;;  %v631_v21 = vld [vmem:[%s2583_s3 + $0x60] sm:$0xff] }
  0x70   : > { %1610 = vmatpush1.bf16.msra.mxu0 %v1609_v36  ;;  %1626 = vmatpush3.bf16.msra.mxu1 %v1623_v5  ;;  %v1643_v20 = vpack.c.bf16 %v630_v19, %v629_v18  ;;  %v632_v22 = vld [vmem:[%s2583_s3 + $0x68] sm:$0xff]  ;;  %v633_v24 = vld [vmem:[%s2583_s3 + $0x70] sm:$0xff]  ;;  %v634_v25 = vld [vmem:[%s2583_s3 + $0x78] sm:$0xff] }
  0x71   : > { %1612 = vmatprep.subr.bf16.mxu0 %v1611_v37  ;;  %1628 = vmatprep.subr.bf16.mxu1 %v1627_v8  ;;  %v1647_v23 = vpack.c.bf16 %v632_v22, %v631_v21  ;;  %v1651_v26 = vpack.c.bf16 %v634_v25, %v633_v24  ;;  %v318_v30 = vld [vmem:[%s2582_s2] sm:$0x3] }
  0x73   : > { %1029 = vxpose.xlu0.b32.cont [5/16] %v274_v54, 128 }
  0x74   : > { %1614 = vmatpush1.bf16.msra.mxu0 %v1613_v43  ;;  %1630 = vmatpush3.bf16.msra.mxu1 %v1627_v8 }
  0x75   : > { %1616 = vmatprep.subr.bf16.mxu0 %v1615_v44 }
  0x77   : > { %1030 = vxpose.xlu0.b32.cont [6/16] %v275_v56, 128 }
  0x78   : > { %1618 = vmatpush1.bf16.msra.mxu0 %v1617_v50 }
  0x79   : > { %1620 = vmatprep.subr.bf16.mxu0 %v1619_v51 }
  0x7b   : > { %1031 = vxpose.xlu0.b32.cont [7/16] %v276_v57, 128 }
  0x7c   : > { %1622 = vmatpush1.bf16.msra.mxu0 %v1621_v55 }
  0x7f   : > { %395 = vmatmul.mubr.f32.vlgmr.msra.gmra.mrb[0].mxu0 %v270_v28  ;;  %1032 = vxpose.xlu0.b32.cont [8/16] %v277_v58, 128  ;;  %v2238_v28 = vshrl.u32 %v320_v27, 7 }
  0x80   : > { %400 = vmatprep.mubr.f32.mxu0 %v1982_v9 }
  0x81   : > { %v326_v29 = vsub.s32 1, %v2238_v28  ;;  %v2248_v37 = vsub.s32 0, %v2238_v28 }
  0x83   : > { %401 = vmatmul.mubr.f32.gmra.mrb[2].mxu0 %v271_v35  ;;  %1033 = vxpose.xlu0.b32.cont [9/16] %v278_v59, 128  ;;  %v2244_v31 = vrot.slane %v318_v30, %v326_v29 }
  0x84   : > { %406 = vmatprep.mubr.f32.mxu0 %v1982_v9 }
  0x87   : > { %407 = vmatmul.mubr.f32.gmra.mrb[4].mxu0 %v272_v42  ;;  %1034 = vxpose.xlu0.b32.cont [10/16] %v279_v60, 128  ;;  %v2252_v42 = vrot.slane %v318_v30, %v2248_v37 }
  0x88   : > { %412 = vmatprep.mubr.f32.mxu0 %v1982_v9 }
  0x8b   : > { %413 = vmatmul.mubr.f32.gmra.mrb[6].mxu0 %v273_v49  ;;  %1035 = vxpose.xlu0.b32.cont [11/16] %v280_v61, 128 }
  0x8c   : > { %418 = vmatprep.mubr.f32.mxu0 %v1982_v9 }
  0x8f   : > { %419 = vmatmul.mubr.f32.gmra.mrb[8].mxu0 %v274_v54  ;;  %1036 = vxpose.xlu0.b32.cont [12/16] %v281_v62, 128 }
  0x90   : > { %424 = vmatprep.mubr.f32.mxu0 %v1982_v9 }
  0x93   : > { %425 = vmatmul.mubr.f32.gmra.mrb[10].mxu0 %v275_v56  ;;  %1037 = vxpose.xlu0.b32.cont [13/16] %v282_v63, 128 }
  0x94   : > { %430 = vmatprep.mubr.f32.mxu0 %v1982_v9 }
  0x97   : > { %431 = vmatmul.mubr.f32.gmra.mrb[12].mxu0 %v276_v57  ;;  %1038 = vxpose.xlu0.b32.cont [14/16] %v283_v0, 128 }
  0x98   : > { %436 = vmatprep.mubr.f32.mxu0 %v1982_v9 }
  0x9b   : > { %437 = vmatmul.mubr.f32.gmra.mrb[14].mxu0 %v277_v58  ;;  %1039 = vxpose.xlu0.b32.cont [15/16] %v284_v1, 128 }
  0x9c   : > { %442 = vmatprep.mubr.f32.mxu0 %v1982_v9 }
  0x9f   : > { %443 = vmatmul.mubr.f32.gmra.mrb[16].mxu0 %v278_v59  ;;  %1040 = vxpose.xlu0.b32.end [16/16] %v285_v2, 128 }
  0xa0   : > { %448 = vmatprep.mubr.f32.mxu0 %v1982_v9 }
  0xa3   : > { %449 = vmatmul.mubr.f32.gmra.mrb[18].mxu0 %v279_v60 }
  0xa4   : > { %454 = vmatprep.mubr.f32.mxu0 %v1982_v9 }
  0xa7   : > { %455 = vmatmul.mubr.f32.gmra.mrb[20].mxu0 %v280_v61 }
  0xa8   : > { %460 = vmatprep.mubr.f32.mxu0 %v1982_v9 }
  0xab   : > { %461 = vmatmul.mubr.f32.gmra.mrb[22].mxu0 %v281_v62 }
  0xac   : > { %466 = vmatprep.mubr.f32.mxu0 %v1982_v9 }
  0xaf   : > { %467 = vmatmul.mubr.f32.gmra.mrb[24].mxu0 %v282_v63 }
  0xb0   : > { %472 = vmatprep.mubr.f32.mxu0 %v1982_v9 }
  0xb3   : > { %473 = vmatmul.mubr.f32.gmra.mrb[26].mxu0 %v283_v0 }
  0xb4   : > { %478 = vmatprep.mubr.f32.mxu0 %v1982_v9 }
  0xb7   : > { %479 = vmatmul.mubr.f32.gmra.mrb[28].mxu0 %v284_v1 }
  0xb8   : > { %484 = vmatprep.mubr.f32.mxu0 %v1982_v9  ;;  %v623_v9 = vld [vmem:[%s2583_s3 + $0x20] sm:$0xff] }
  0xb9   : > { %v1631_v11 = vpack.c.bf16 %v624_v10, %v623_v9 }
  0xbb   : > { %485 = vmatmul.mubr.f32.gmra.mrb[30].mxu0 %v285_v2  ;;  %1632 = vmatprep.subr.bf16.mxu1 %v1631_v11 }
  0xbc   : > { %1634 = vmatpush3.bf16.msra.mxu1 %v1631_v11 }
  0xbd   : > { %1636 = vmatprep.subr.bf16.mxu1 %v1635_v14 }
  0xc0   : > { %1638 = vmatpush3.bf16.msra.mxu1 %v1635_v14 }
  0xc1   : > { %1640 = vmatprep.subr.bf16.mxu1 %v1639_v17 }
  0xc4   : > { %1642 = vmatpush3.bf16.msra.mxu1 %v1639_v17 }
  0xc5   : > { %1644 = vmatprep.subr.bf16.mxu1 %v1643_v20 }
  0xc8   : > { %1646 = vmatpush3.bf16.msra.mxu1 %v1643_v20 }
  0xc9   : > { %1648 = vmatprep.subr.bf16.mxu1 %v1647_v23 }
  0xcc   : > { %1650 = vmatpush3.bf16.msra.mxu1 %v1647_v23 }
  0xcd   : > { %1652 = vmatprep.subr.bf16.mxu1 %v1651_v26 }
  0xd0   : > { %1654 = vmatpush3.bf16.msra.mxu1 %v1651_v26 }
 0x152   : > { %v396_v32 = vpop.f32.mrb[0].mxu0 }
 0x153   : > { %v398_v33 = vpop.f32.mrb[1].mxu0  ;;  %v397_v47 = vadd.f32 %v396_v32, %v2252_v42 }
 0x154   : > { %v399_v34 = vadd.f32 %v398_v33, %v2244_v31 }
 0x156   : > { %v1393_v35 = vmul.f32 -1.442695, %v399_v34  ;;  %v402_v36 = vpop.f32.mrb[2].mxu0 }
 0x157   : > { %v404_v38 = vpop.f32.mrb[3].mxu0  ;;  %v403_v54 = vadd.f32 %v402_v36, %v2252_v42 }
 0x158   : > { %1744 = vpow2.f32 %v1393_v35  ;;  %v405_v39 = vadd.f32 %v404_v38, %v2244_v31 }
 0x15a   : > { %v1394_v40 = vmul.f32 -1.442695, %v405_v39  ;;  %v408_v41 = vpop.f32.mrb[4].mxu0 }
 0x15b   : > { %v410_v43 = vpop.f32.mrb[5].mxu0  ;;  %v409_v61 = vadd.f32 %v408_v41, %v2252_v42 }
 0x15c   : > { %1746 = vpow2.f32 %v1394_v40  ;;  %v411_v44 = vadd.f32 %v410_v43, %v2244_v31 }
 0x15e   : > { %v1395_v45 = vmul.f32 -1.442695, %v411_v44  ;;  %v414_v46 = vpop.f32.mrb[6].mxu0 }
 0x15f   : > { %v416_v48 = vpop.f32.mrb[7].mxu0  ;;  %v415_v4 = vadd.f32 %v414_v46, %v2252_v42 }
 0x160   : > { %1748 = vpow2.f32 %v1395_v45  ;;  %v417_v49 = vadd.f32 %v416_v48, %v2244_v31 }
 0x161   : > { %1750 = vtanh.f32 %v397_v47 }
 0x162   : > { %v1745_v50 = vpop.eup %1744  ;;  %v1396_v51 = vmul.f32 -1.442695, %v417_v49  ;;  %v420_v52 = vpop.f32.mrb[8].mxu0 }
 0x163   : > { %v555_v53 = vadd.f32 1.0, %v1745_v50  ;;  %v422_v55 = vpop.f32.mrb[9].mxu0  ;;  %v421_v13 = vadd.f32 %v420_v52, %v2252_v42 }
 0x164   : > { %1752 = vpow2.f32 %v1396_v51  ;;  %v423_v56 = vadd.f32 %v422_v55, %v2244_v31 }
 0x165   : > { %1754 = vrcp.f32 %v555_v53 }
 0x166   : > { %v1747_v57 = vpop.eup %1746  ;;  %v1397_v58 = vmul.f32 -1.442695, %v423_v56  ;;  %v426_v59 = vpop.f32.mrb[10].mxu0  ;;  %1756 = vtanh.f32 %v403_v54 }
 0x167   : > { %v556_v60 = vadd.f32 1.0, %v1747_v57  ;;  %v428_v62 = vpop.f32.mrb[11].mxu0  ;;  %v427_v23 = vadd.f32 %v426_v59, %v2252_v42 }
 0x168   : > { %1758 = vpow2.f32 %v1397_v58  ;;  %v429_v63 = vadd.f32 %v428_v62, %v2244_v31 }
 0x169   : > { %1760 = vrcp.f32 %v556_v60 }
 0x16a   : > { %v1749_v0 = vpop.eup %1748  ;;  %v1398_v1 = vmul.f32 -1.442695, %v429_v63  ;;  %v432_v2 = vpop.f32.mrb[12].mxu0  ;;  %1762 = vtanh.f32 %v409_v61 }
 0x16b   : > { %v557_v3 = vadd.f32 1.0, %v1749_v0  ;;  %v434_v5 = vpop.f32.mrb[13].mxu0  ;;  %v1751_v7 = vpop.eup %1750  ;;  %v433_v35 = vadd.f32 %v432_v2, %v2252_v42 }
 0x16c   : > { %1764 = vpow2.f32 %v1398_v1  ;;  %v435_v6 = vadd.f32 %v434_v5, %v2244_v31 }
 0x16d   : > { %1766 = vrcp.f32 %v557_v3 }
 0x16e   : > { %v1753_v8 = vpop.eup %1752  ;;  %v1399_v9 = vmul.f32 -1.442695, %v435_v6  ;;  %v438_v10 = vpop.f32.mrb[14].mxu0  ;;  %1768 = vtanh.f32 %v415_v4 }
 0x16f   : > { %v1755_v11 = vpop.eup %1754  ;;  %v558_v12 = vadd.f32 1.0, %v1753_v8  ;;  %v440_v14 = vpop.f32.mrb[15].mxu0  ;;  %v439_v47 = vadd.f32 %v438_v10, %v2252_v42 }
 0x170   : > { %1770 = vpow2.f32 %v1399_v9  ;;  %v441_v15 = vadd.f32 %v440_v14, %v2244_v31  ;;  %v603_v16 = vmul.f32 %v1755_v11, %v1751_v7  ;;  %v1757_v17 = vpop.eup %1756 }
 0x171   : > { %1772 = vrcp.f32 %v558_v12 }
 0x172   : > { %v1759_v18 = vpop.eup %1758  ;;  %v1400_v19 = vmul.f32 -1.442695, %v441_v15  ;;  %v444_v20 = vpop.f32.mrb[16].mxu0  ;;  %1511 = vmatprep.mubr.f32.mxu1 %v603_v16  ;;  %1774 = vtanh.f32 %v421_v13 }
 0x173   : > { %v1761_v21 = vpop.eup %1760  ;;  %v559_v22 = vadd.f32 1.0, %v1759_v18  ;;  %v446_v24 = vpop.f32.mrb[17].mxu0  ;;  %v445_v57 = vadd.f32 %v444_v20, %v2252_v42 }
 0x174   : > { %1776 = vpow2.f32 %v1400_v19  ;;  %v447_v25 = vadd.f32 %v446_v24, %v2244_v31  ;;  %v604_v26 = vmul.f32 %v1761_v21, %v1757_v17  ;;  %v1763_v27 = vpop.eup %1762 }
 0x175   : > { %1778 = vrcp.f32 %v559_v22 }
 0x176   : > { %v1765_v29 = vpop.eup %1764  ;;  %v1401_v30 = vmul.f32 -1.442695, %v447_v25  ;;  %v450_v32 = vpop.f32.mrb[18].mxu0  ;;  %1512 = vmatmul.mubr.f32.vlgmr.msra.gmra.mrb[0].mxu1 %v604_v26  ;;  %1780 = vtanh.f32 %v427_v23 }
 0x177   : > { %v1767_v33 = vpop.eup %1766  ;;  %v560_v34 = vadd.f32 1.0, %v1765_v29  ;;  %v452_v36 = vpop.f32.mrb[19].mxu0  ;;  %v451_v3 = vadd.f32 %v450_v32, %v2252_v42 }
 0x178   : > { %1782 = vpow2.f32 %v1401_v30  ;;  %v453_v38 = vadd.f32 %v452_v36, %v2244_v31  ;;  %v605_v39 = vmul.f32 %v1767_v33, %v1763_v27  ;;  %v1769_v40 = vpop.eup %1768 }
 0x179   : > { %1784 = vrcp.f32 %v560_v34 }
 0x17a   : > { %v1771_v41 = vpop.eup %1770  ;;  %v1402_v43 = vmul.f32 -1.442695, %v453_v38  ;;  %v456_v44 = vpop.f32.mrb[20].mxu0  ;;  %1514 = vmatprep.mubr.f32.mxu1 %v605_v39  ;;  %1786 = vtanh.f32 %v433_v35 }
 0x17b   : > { %v1773_v45 = vpop.eup %1772  ;;  %v561_v46 = vadd.f32 1.0, %v1771_v41  ;;  %v458_v48 = vpop.f32.mrb[21].mxu0  ;;  %v457_v13 = vadd.f32 %v456_v44, %v2252_v42 }
 0x17c   : > { %1788 = vpow2.f32 %v1402_v43  ;;  %v459_v49 = vadd.f32 %v458_v48, %v2244_v31  ;;  %v606_v50 = vmul.f32 %v1773_v45, %v1769_v40  ;;  %v1775_v51 = vpop.eup %1774 }
 0x17d   : > { %1790 = vrcp.f32 %v561_v46 }
 0x17e   : > { %v1777_v52 = vpop.eup %1776  ;;  %v1403_v53 = vmul.f32 -1.442695, %v459_v49  ;;  %v462_v54 = vpop.f32.mrb[22].mxu0  ;;  %1515 = vmatmul.mubr.f32.gmra.mrb[2].mxu1 %v606_v50  ;;  %1792 = vtanh.f32 %v439_v47 }
 0x17f   : > { %v1779_v55 = vpop.eup %1778  ;;  %v562_v56 = vadd.f32 1.0, %v1777_v52  ;;  %v464_v58 = vpop.f32.mrb[23].mxu0  ;;  %v463_v23 = vadd.f32 %v462_v54, %v2252_v42 }
 0x180   : > { %1794 = vpow2.f32 %v1403_v53  ;;  %v465_v59 = vadd.f32 %v464_v58, %v2244_v31  ;;  %v607_v60 = vmul.f32 %v1779_v55, %v1775_v51  ;;  %v1781_v61 = vpop.eup %1780 }
 0x181   : > { %1796 = vrcp.f32 %v562_v56 }
 0x182   : > { %v1783_v62 = vpop.eup %1782  ;;  %v1404_v63 = vmul.f32 -1.442695, %v465_v59  ;;  %v468_v0 = vpop.f32.mrb[24].mxu0  ;;  %1517 = vmatprep.mubr.f32.mxu1 %v607_v60  ;;  %1798 = vtanh.f32 %v445_v57 }
 0x183   : > { %v1785_v1 = vpop.eup %1784  ;;  %v563_v2 = vadd.f32 1.0, %v1783_v62  ;;  %v470_v4 = vpop.f32.mrb[25].mxu0  ;;  %v469_v35 = vadd.f32 %v468_v0, %v2252_v42 }
 0x184   : > { %1800 = vpow2.f32 %v1404_v63  ;;  %v471_v5 = vadd.f32 %v470_v4, %v2244_v31  ;;  %v608_v6 = vmul.f32 %v1785_v1, %v1781_v61  ;;  %v1787_v7 = vpop.eup %1786 }
 0x185   : > { %1802 = vrcp.f32 %v563_v2 }
 0x186   : > { %v1789_v8 = vpop.eup %1788  ;;  %v1405_v9 = vmul.f32 -1.442695, %v471_v5  ;;  %v474_v10 = vpop.f32.mrb[26].mxu0  ;;  %1518 = vmatmul.mubr.f32.gmra.mrb[4].mxu1 %v608_v6  ;;  %1804 = vtanh.f32 %v451_v3 }
 0x187   : > { %v1791_v11 = vpop.eup %1790  ;;  %v564_v12 = vadd.f32 1.0, %v1789_v8  ;;  %v476_v14 = vpop.f32.mrb[27].mxu0  ;;  %v475_v46 = vadd.f32 %v474_v10, %v2252_v42 }
 0x188   : > { %1806 = vpow2.f32 %v1405_v9  ;;  %v477_v15 = vadd.f32 %v476_v14, %v2244_v31  ;;  %v609_v16 = vmul.f32 %v1791_v11, %v1787_v7  ;;  %v1793_v17 = vpop.eup %1792  ;;  %v1041_v8 = vpop.trf.xlu0  ;;  %v790_v11 = vadd.s32 8, %v2238_v28 }
 0x189   : > { %1808 = vrcp.f32 %v564_v12  ;;  %v2286_v12 = vstv %s1410_s7  ;;  %v794_v14 = vadd.s32 40, %v2238_v28 }
 0x18a   : > { %v1795_v18 = vpop.eup %1794  ;;  %v1406_v19 = vmul.f32 -1.442695, %v477_v15  ;;  %v480_v20 = vpop.f32.mrb[28].mxu0  ;;  %1520 = vmatprep.mubr.f32.mxu1 %v609_v16  ;;  %1810 = vtanh.f32 %v457_v13  ;;  %v793_v16 = vadd.s32 32, %v2238_v28 }
 0x18b   : > { %v1797_v21 = vpop.eup %1796  ;;  %v565_v22 = vadd.f32 1.0, %v1795_v18  ;;  %v482_v24 = vpop.f32.mrb[29].mxu0  ;;  %v807_v18 = vadd.s32 %v2286_v12, %v790_v11 }
 0x18c   : > { %1812 = vpow2.f32 %v1406_v19  ;;  %v483_v25 = vadd.f32 %v482_v24, %v2244_v31  ;;  %v610_v26 = vmul.f32 %v1797_v21, %v1793_v17  ;;  %v1799_v27 = vpop.eup %1798  ;;  %v2293_v17 = vld [vmem:[%s2584_s4] ss:$0 sm:$0xff]  ;;  %v806_v19 = vadd.s32 %v2286_v12, %v2238_v28 }
 0x18d   : > { %1814 = vrcp.f32 %v565_v22  ;;  %v810_v22 = vadd.s32 %v2286_v12, %v793_v16  ;;  %vm823_vm2 = vcmp.lt.s32.totalorder %v807_v18, 200  ;;  %v792_v24 = vadd.s32 24, %v2238_v28 }
 0x18e   : > { %v1801_v29 = vpop.eup %1800  ;;  %v1407_v30 = vmul.f32 -1.442695, %v483_v25  ;;  %v486_v32 = vpop.f32.mrb[30].mxu0  ;;  %1521 = vmatmul.mubr.f32.gmra.mrb[6].mxu1 %v610_v26  ;;  %1816 = vtanh.f32 %v463_v23  ;;  %vm822_vm3 = vcmp.lt.s32.totalorder %v806_v19, 200  ;;  %v791_v25 = vadd.s32 16, %v2238_v28 }
 0x18f   : > { %v1803_v33 = vpop.eup %1802  ;;  %v566_v34 = vadd.f32 1.0, %v1801_v29  ;;  %v488_v36 = vpop.f32.mrb[31].mxu0  ;;  %v487_v57 = vadd.f32 %v486_v32, %v2252_v42  ;;  %v796_v26 = vadd.s32 56, %v2238_v28  ;;  %v795_v29 = vadd.s32 48, %v2238_v28 }
 0x190   : > { %1818 = vpow2.f32 %v1407_v30  ;;  %v489_v38 = vadd.f32 %v488_v36, %v2244_v31  ;;  %v611_v39 = vmul.f32 %v1803_v33, %v1799_v27  ;;  %v1805_v40 = vpop.eup %1804  ;;  %v481_v31 = vadd.f32 %v480_v20, %v2252_v42 }
 0x191   : > { %1820 = vrcp.f32 %v566_v34  ;;  %v811_v20 = vadd.s32 %v2286_v12, %v794_v14  ;;  %vm826_vm6 = vcmp.lt.s32.totalorder %v810_v22, 200 }
 0x192   : > { %v1807_v41 = vpop.eup %1806  ;;  %v1408_v43 = vmul.f32 -1.442695, %v489_v38  ;;  %1523 = vmatprep.mubr.f32.mxu1 %v611_v39  ;;  %1822 = vtanh.f32 %v469_v35  ;;  %v809_v35 = vadd.s32 %v2286_v12, %v792_v24  ;;  %v808_v38 = vadd.s32 %v2286_v12, %v791_v25 }
 0x193   : > { %v1809_v44 = vpop.eup %1808  ;;  %v567_v45 = vadd.f32 1.0, %v1807_v41  ;;  %vm827_vm4 = vcmp.lt.s32.totalorder %v811_v20, 200  ;;  %v801_v24 = vadd.s32 96, %v2238_v28 }
 0x194   : > { %1824 = vpow2.f32 %v1408_v43  ;;  %v612_v47 = vmul.f32 %v1809_v44, %v1805_v40  ;;  %v1811_v48 = vpop.eup %1810  ;;  %v813_v40 = vadd.s32 %v2286_v12, %v796_v26  ;;  %vm825_vm7 = vcmp.lt.s32.totalorder %v809_v35, 200 }
 0x195   : > { %1826 = vrcp.f32 %v567_v45  ;;  %v812_v45 = vadd.s32 %v2286_v12, %v795_v29  ;;  %vm824_vm8 = vcmp.lt.s32.totalorder %v808_v38, 200 }
 0x196   : > { %v1813_v49 = vpop.eup %1812  ;;  %1524 = vmatmul.mubr.f32.gmra.mrb[8].mxu1 %v612_v47  ;;  %1828 = vtanh.f32 %v475_v46  ;;  %vm829_vm9 = vcmp.lt.s32.totalorder %v813_v40, 200 }
 0x197   : > { %v1815_v50 = vpop.eup %1814  ;;  %v568_v51 = vadd.f32 1.0, %v1813_v49  ;;  %vm828_vm10 = vcmp.lt.s32.totalorder %v812_v45, 200 }
 0x198   : > { %v613_v52 = vmul.f32 %v1815_v50, %v1811_v48  ;;  %v1817_v53 = vpop.eup %1816 }
 0x199   : > { %1830 = vrcp.f32 %v568_v51 }
 0x19a   : > { %v1819_v54 = vpop.eup %1818  ;;  %1526 = vmatprep.mubr.f32.mxu1 %v613_v52  ;;  %1832 = vtanh.f32 %v481_v31  ;;  %v798_v52 = vadd.s32 72, %v2238_v28 }
 0x19b   : > { %v1821_v55 = vpop.eup %1820  ;;  %v569_v56 = vadd.f32 1.0, %v1819_v54 }
 0x19c   : > { %v614_v58 = vmul.f32 %v1821_v55, %v1817_v53  ;;  %v1823_v59 = vpop.eup %1822 }
 0x19d   : > { %1834 = vrcp.f32 %v569_v56  ;;  %v797_v56 = vadd.s32 64, %v2238_v28 }
 0x19e   : > { %v1825_v60 = vpop.eup %1824  ;;  %1527 = vmatmul.mubr.f32.gmra.mrb[10].mxu1 %v614_v58  ;;  %1836 = vtanh.f32 %v487_v57 }
 0x19f   : > { %v1827_v61 = vpop.eup %1826  ;;  %v570_v62 = vadd.f32 1.0, %v1825_v60 }
 0x1a0   : > { %v615_v63 = vmul.f32 %v1827_v61, %v1823_v59  ;;  %v1829_v0 = vpop.eup %1828 }
 0x1a1   : > { %1838 = vrcp.f32 %v570_v62 }
 0x1a2   : > { %1529 = vmatprep.mubr.f32.mxu1 %v615_v63  ;;  %v815_v63 = vadd.s32 %v2286_v12, %v798_v52 }
 0x1a3   : > { %v1831_v1 = vpop.eup %1830 }
 0x1a4   : > { %v616_v2 = vmul.f32 %v1831_v1, %v1829_v0  ;;  %v1833_v3 = vpop.eup %1832  ;;  %vm831_vm11 = vcmp.lt.s32.totalorder %v815_v63, 200 }
 0x1a6   : > { %1530 = vmatmul.mubr.f32.gmra.mrb[12].mxu1 %v616_v2 }
 0x1a7   : > { %v1835_v4 = vpop.eup %1834 }
 0x1a8   : > { %v617_v5 = vmul.f32 %v1835_v4, %v1833_v3  ;;  %v1837_v42 = vpop.eup %1836  ;;  %v814_v3 = vadd.s32 %v2286_v12, %v797_v56 }
 0x1aa   : > { %1532 = vmatprep.mubr.f32.mxu1 %v617_v5  ;;  %vm830_vm12 = vcmp.lt.s32.totalorder %v814_v3, 200 }
 0x1ab   : > { %v1839_v6 = vpop.eup %1838 }
 0x1ac   : > { %v618_v7 = vmul.f32 %v1839_v6, %v1837_v42  ;;  %v800_v42 = vadd.s32 88, %v2238_v28 }
 0x1ae   : > { %1533 = vmatmul.mubr.f32.gmra.mrb[14].mxu1 %v618_v7  ;;  %v817_v14 = vadd.s32 %v2286_v12, %v800_v42 }
 0x1af   : > { %1567 = vmatprep.mubr.f32.mxu1 %v1041_v8  ;;  %v799_v8 = vadd.s32 80, %v2238_v28 }
 0x1b0   : > { %vm833_vm13 = vcmp.lt.s32.totalorder %v817_v14, 200 }
 0x1b1   : > { %v816_v18 = vadd.s32 %v2286_v12, %v799_v8 }
 0x1b3   : > { %vm832_vm14 = vcmp.lt.s32.totalorder %v816_v18, 200 }
 0x249   : > { %v1513_v9 = vpop.f32.mrb[0].mxu1 }
 0x24a   : > { %v708_v10 = vpop.f32.mrb[1].mxu1  ;;  %v714_v21 = vadd.f32 %v1513_v9, %v2293_v17 }
 0x24b   : > { %v709_v23 = vadd.f32 %v2293_v17, %v708_v10 }
 0x24c   : > { %v2306_v30 = vsel %vm823_vm2, %v714_v21, -1e+30  ;;  %v802_v21 = vadd.s32 104, %v2238_v28 }
 0x24d   : > { %v2309_v34 = vsel %vm822_vm3, %v709_v23, -1e+30  ;;  %v889_v41 = vsel %vm887_vm5, %v2306_v30, -inf  ;;  %vm1023_vm3 = vcmask 73728  }
 0x24e   : > { %v888_v46 = vsel %vm887_vm5, %v2309_v34, -inf }
 0x251   : > { %v1516_v13 = vpop.f32.mrb[2].mxu1 }
 0x252   : > { %v718_v15 = vpop.f32.mrb[3].mxu1  ;;  %v724_v47 = vadd.f32 %v1516_v13, %v2293_v17 }
 0x253   : > { %v719_v50 = vadd.f32 %v2293_v17, %v718_v15 }
 0x254   : > { %v2331_v53 = vsel %vm825_vm7, %v724_v47, -1e+30 }
 0x255   : > { %v2335_v57 = vsel %vm824_vm8, %v719_v50, -1e+30  ;;  %v891_v60 = vsel %vm887_vm5, %v2331_v53, -inf }
 0x256   : > { %v890_v0 = vsel %vm887_vm5, %v2335_v57, -inf }
 0x259   : > { %v1519_v27 = vpop.f32.mrb[4].mxu1 }
 0x25a   : > { %v734_v32 = vadd.f32 %v1519_v27, %v2293_v17  ;;  %v728_v33 = vpop.f32.mrb[5].mxu1 }
 0x25b   : > { %v729_v36 = vadd.f32 %v2293_v17, %v728_v33 }
 0x25c   : > { %v2314_v39 = vsel %vm827_vm4, %v734_v32, -1e+30  ;;  %v819_v32 = vadd.s32 %v2286_v12, %v802_v21 }
 0x25d   : > { %v894_v43 = vsel %vm887_vm5, %v2314_v39, -inf  ;;  %v2321_v44 = vsel %vm826_vm6, %v729_v36, -1e+30  ;;  %v818_v36 = vadd.s32 %v2286_v12, %v801_v24 }
 0x25e   : > { %v895_v48 = vmax.f32 %v889_v41, %v894_v43  ;;  %v892_v49 = vsel %vm887_vm5, %v2321_v44, -inf  ;;  %vm835_vm15 = vcmp.lt.s32.totalorder %v819_v32, 200  ;;  %v804_v41 = vadd.s32 120, %v2238_v28 }
 0x25f   : > { %v893_v51 = vmax.f32 %v888_v46, %v892_v49  ;;  %vm834_vm0 = vcmp.lt.s32.totalorder %v818_v36, 200  ;;  %v803_v46 = vadd.s32 112, %v2238_v28 }
 0x261   : > { %v1522_v31 = vpop.f32.mrb[6].mxu1 }
 0x262   : > { %v744_v54 = vadd.f32 %v1522_v31, %v2293_v17  ;;  %v738_v55 = vpop.f32.mrb[7].mxu1 }
 0x263   : > { %v739_v58 = vadd.f32 %v2293_v17, %v738_v55 }
 0x264   : > { %v2338_v59 = vsel %vm829_vm9, %v744_v54, -1e+30  ;;  %v820_v54 = vadd.s32 %v2286_v12, %v803_v46 }
 0x265   : > { %v898_v61 = vsel %vm887_vm5, %v2338_v59, -inf  ;;  %v2344_v62 = vsel %vm828_vm10, %v739_v58, -1e+30 }
 0x266   : > { %v899_v1 = vmax.f32 %v891_v60, %v898_v61  ;;  %v896_v2 = vsel %vm887_vm5, %v2344_v62, -inf  ;;  %vm836_vm2 = vcmp.lt.s32.totalorder %v820_v54, 200 }
 0x267   : > { %v897_v4 = vmax.f32 %v890_v0, %v896_v2 }
 0x269   : > { %v1525_v5 = vpop.f32.mrb[8].mxu1 }
 0x26a   : > { %v754_v6 = vadd.f32 %v1525_v5, %v2293_v17  ;;  %v748_v7 = vpop.f32.mrb[9].mxu1 }
 0x26b   : > { %v749_v9 = vadd.f32 %v2293_v17, %v748_v7 }
 0x26c   : > { %v2356_v10 = vsel %vm831_vm11, %v754_v6, -1e+30 }
 0x26d   : > { %v902_v11 = vsel %vm887_vm5, %v2356_v10, -inf  ;;  %v2360_v13 = vsel %vm830_vm12, %v749_v9, -1e+30 }
 0x26e   : > { %v903_v15 = vmax.f32 %v895_v48, %v902_v11  ;;  %v900_v16 = vsel %vm887_vm5, %v2360_v13, -inf  ;;  %v2401_v11 = vpop.trf.xlu0 }
 0x26f   : > { %v901_v19 = vmax.f32 %v893_v51, %v900_v16  ;;  %v821_v51 = vadd.s32 %v2286_v12, %v804_v41 }
 0x271   : > { %v1528_v20 = vpop.f32.mrb[10].mxu1  ;;  %vm837_vm1 = vcmp.lt.s32.totalorder %v821_v51, 200 }
 0x272   : > { %v764_v22 = vadd.f32 %v1528_v20, %v2293_v17  ;;  %v758_v23 = vpop.f32.mrb[11].mxu1  ;;  %v2412_v18 = vpop.trf.xlu0 }
 0x273   : > { %v759_v25 = vadd.f32 %v2293_v17, %v758_v23 }
 0x274   : > { %v2370_v26 = vsel %vm833_vm13, %v764_v22, -1e+30 }
 0x275   : > { %v906_v27 = vsel %vm887_vm5, %v2370_v26, -inf  ;;  %v2374_v29 = vsel %vm832_vm14, %v759_v25, -1e+30 }
 0x276   : > { %v907_v33 = vmax.f32 %v899_v1, %v906_v27  ;;  %v904_v35 = vsel %vm887_vm5, %v2374_v29, -inf }
 0x277   : > { %v905_v38 = vmax.f32 %v897_v4, %v904_v35 }
 0x279   : > { %v1531_v40 = vpop.f32.mrb[12].mxu1 }
 0x27a   : > { %v774_v43 = vadd.f32 %v1531_v40, %v2293_v17  ;;  %v768_v45 = vpop.f32.mrb[13].mxu1  ;;  %v2422_v40 = vpop.trf.xlu0 }
 0x27b   : > { %v769_v47 = vadd.f32 %v2293_v17, %v768_v45 }
 0x27c   : > { %v2384_v48 = vsel %vm835_vm15, %v774_v43, -1e+30 }
 0x27d   : > { %v910_v49 = vsel %vm887_vm5, %v2384_v48, -inf  ;;  %v2388_v50 = vsel %vm834_vm0, %v769_v47, -1e+30 }
 0x27e   : > { %v911_v31 = vmax.f32 %v903_v15, %v910_v49  ;;  %v908_v52 = vsel %vm887_vm5, %v2388_v50, -inf  ;;  %v2431_v47 = vpop.trf.xlu0 }
 0x27f   : > { %v909_v55 = vmax.f32 %v901_v19, %v908_v52 }
 0x281   : > { %v916_v56 = vmax.f32 %v909_v55, %v911_v31  ;;  %v1534_v28 = vpop.f32.mrb[14].mxu1 }
 0x282   : > { %v784_v58 = vadd.f32 %v1534_v28, %v2293_v17  ;;  %v778_v60 = vpop.f32.mrb[15].mxu1  ;;  %v2436_v55 = vpop.trf.xlu0 }
 0x283   : > { %v779_v61 = vadd.f32 %v2293_v17, %v778_v60  ;;  %v2403_v17 = vld [vmem:[#allocation2] sm:$0x1] }
 0x284   : > { %v2396_v63 = vsel %vm837_vm1, %v784_v58, -1e+30 }
 0x285   : > { %v914_v0 = vsel %vm887_vm5, %v2396_v63, -inf  ;;  %v884_v1 = vsel %vm836_vm2, %v779_v61, -1e+30 }
 0x286   : > { %v915_v2 = vmax.f32 %v907_v33, %v914_v0  ;;  %v912_v3 = vsel %vm887_vm5, %v884_v1, -inf }
 0x287   : > { %v913_v12 = vmax.f32 %v905_v38, %v912_v3 }
 0x289   : > { %v917_v4 = vmax.f32 %v913_v12, %v915_v2 }
 0x28b   : > { %v918_v5 = vmax.f32 %v916_v56, %v917_v4 }
 0x28d   : > { %v919_v42 = vrot.slane %v918_v5, 4 }
 0x28f   : > { %v920_v6 = vmax.f32 %v918_v5, %v919_v42 }
 0x291   : > { %v921_v7 = vrot.slane %v920_v6, 2 }
 0x293   : > { %v922_v8 = vmax.f32 %v920_v6, %v921_v7  ;;  %v2441_v7 = vpop.trf.xlu0 }
 0x295   : > { %v923_v9 = vrot.slane %v922_v8, 1 }
 0x297   : > { %v924_v14 = vmax.f32 %v922_v8, %v923_v9 }
 0x299   : > { %v2406_v15 = vmax.f32 %v2403_v17, %v924_v14 }
 0x29b   : > { %v933_v16 = vrot.slane %v2406_v15, %v2248_v37  ;;  %1272 = vst.msk [vmem:[#allocation2] sm:$0x1] %vm1023_vm3, %v2406_v15 }
 0x29d   : > { %v949_v19 = vsub.f32 %v884_v1, %v933_v16  ;;  %v935_v20 = vsub.f32 %v2309_v34, %v933_v16  ;;  %v936_v21 = vsub.f32 %v2306_v30, %v933_v16  ;;  %v937_v22 = vsub.f32 %v2335_v57, %v933_v16 }
 0x29e   : > { %v938_v23 = vsub.f32 %v2331_v53, %v933_v16  ;;  %v939_v24 = vsub.f32 %v2321_v44, %v933_v16  ;;  %v940_v25 = vsub.f32 %v2314_v39, %v933_v16  ;;  %v941_v36 = vsub.f32 %v2344_v62, %v933_v16 }
 0x29f   : > { %v979_v27 = vmul.f32 1.442695, %v949_v19  ;;  %v951_v32 = vmul.f32 1.442695, %v935_v20  ;;  %v953_v33 = vmul.f32 1.442695, %v936_v21  ;;  %v942_v34 = vsub.f32 %v2338_v59, %v933_v16 }
 0x2a0   : > { %v955_v35 = vmul.f32 1.442695, %v937_v22  ;;  %v957_v38 = vmul.f32 1.442695, %v938_v23  ;;  %v943_v30 = vsub.f32 %v2360_v13, %v933_v16  ;;  %v959_v53 = vmul.f32 1.442695, %v939_v24 }
 0x2a1   : > { %1840 = vpow2.f32 %v979_v27  ;;  %v944_v44 = vsub.f32 %v2356_v10, %v933_v16  ;;  %v945_v39 = vsub.f32 %v2374_v29, %v933_v16  ;;  %v961_v57 = vmul.f32 1.442695, %v940_v25 }
 0x2a2   : > { %1842 = vpow2.f32 %v951_v32  ;;  %v946_v41 = vsub.f32 %v2370_v26, %v933_v16  ;;  %v963_v62 = vmul.f32 1.442695, %v941_v36  ;;  %v947_v43 = vsub.f32 %v2388_v50, %v933_v16  ;;  %v1048_v36 = vpop.trf.xlu0 }
 0x2a3   : > { %1844 = vpow2.f32 %v953_v33  ;;  %v965_v59 = vmul.f32 1.442695, %v942_v34  ;;  %v948_v45 = vsub.f32 %v2384_v48, %v933_v16  ;;  %v950_v13 = vsub.f32 %v2396_v63, %v933_v16 }
 0x2a4   : > { %1846 = vpow2.f32 %v955_v35  ;;  %v967_v46 = vmul.f32 1.442695, %v943_v30  ;;  %v969_v10 = vmul.f32 1.442695, %v944_v44  ;;  %v971_v29 = vmul.f32 1.442695, %v945_v39 }
 0x2a5   : > { %1848 = vpow2.f32 %v957_v38  ;;  %v973_v26 = vmul.f32 1.442695, %v946_v41  ;;  %v975_v49 = vmul.f32 1.442695, %v947_v43  ;;  %v977_v50 = vmul.f32 1.442695, %v948_v45 }
 0x2a6   : > { %1850 = vpow2.f32 %v959_v53  ;;  %v981_v48 = vmul.f32 1.442695, %v950_v13  ;;  %v1049_v43 = vpop.trf.xlu0  ;;  %v926_v13 = vsub.f32 %v2403_v17, %v2406_v15 }
 0x2a7   : > { %1852 = vpow2.f32 %v961_v57 }
 0x2a8   : > { %1854 = vpow2.f32 %v963_v62 }
 0x2a9   : > { %1856 = vpow2.f32 %v965_v59 }
 0x2aa   : > { %1858 = vpow2.f32 %v967_v46 }
 0x2ab   : > { %v2433_v51 = vpop.eup %1840  ;;  %1860 = vpow2.f32 %v969_v10 }
 0x2ac   : > { %v1843_v31 = vpop.eup %1842  ;;  %1862 = vpow2.f32 %v971_v29 }
 0x2ad   : > { %v1845_v52 = vpop.eup %1844  ;;  %v985_v54 = vsel %vm887_vm5, %v1843_v31, 0.0  ;;  %1864 = vpow2.f32 %v973_v26 }
 0x2ae   : > { %v1847_v56 = vpop.eup %1846  ;;  %v986_v28 = vsel %vm887_vm5, %v1845_v52, 0.0  ;;  %v1655_v58 = vpack.c.bf16 %v1845_v52, %v1843_v31  ;;  %1866 = vpow2.f32 %v975_v49  ;;  %v1050_v49 = vpop.trf.xlu0  ;;  %v1012_v52 = vsel %vm887_vm5, %v2433_v51, 0.0 }
 0x2af   : > { %v1849_v60 = vpop.eup %1848  ;;  %v987_v61 = vadd.f32 %v986_v28, %v985_v54  ;;  %1868 = vpow2.f32 %v977_v50  ;;  %v988_v0 = vsel %vm887_vm5, %v1847_v56, 0.0  ;;  %v927_v50 = vmul.f32 1.442695, %v926_v13 }
 0x2b0   : > { %v1851_v63 = vpop.eup %1850  ;;  %1656 = vmatprep.subr.bf16.mxu1 %v1655_v58  ;;  %v1659_v1 = vpack.c.bf16 %v1849_v60, %v1847_v56  ;;  %1870 = vpow2.f32 %v981_v48  ;;  %v990_v4 = vsel %vm887_vm5, %v1849_v60, 0.0 }
 0x2b1   : > { %v1853_v2 = vpop.eup %1852  ;;  %1658 = vmatpush3.bf16.msra.mxu1 %v1655_v58  ;;  %v989_v3 = vadd.f32 %v988_v0, %v987_v61  ;;  %v992_v9 = vsel %vm887_vm5, %v1851_v63, 0.0  ;;  %1872 = vpow2.f32 %v927_v50 }
 0x2b2   : > { %v1855_v12 = vpop.eup %1854  ;;  %1660 = vmatprep.subr.bf16.mxu1 %v1659_v1  ;;  %v1663_v5 = vpack.c.bf16 %v1853_v2, %v1851_v63  ;;  %v994_v21 = vsel %vm887_vm5, %v1853_v2, 0.0  ;;  %v1051_v56 = vpop.trf.xlu0 }
 0x2b3   : > { %v1857_v42 = vpop.eup %1856  ;;  %v991_v6 = vadd.f32 %v990_v4, %v989_v3  ;;  %v996_v27 = vsel %vm887_vm5, %v1855_v12, 0.0 }
 0x2b4   : > { %v1859_v8 = vpop.eup %1858  ;;  %v1667_v14 = vpack.c.bf16 %v1857_v42, %v1855_v12  ;;  %v998_v34 = vsel %vm887_vm5, %v1857_v42, 0.0 }
 0x2b5   : > { %v1861_v16 = vpop.eup %1860  ;;  %1662 = vmatpush3.bf16.msra.mxu1 %v1659_v1  ;;  %v993_v19 = vadd.f32 %v992_v9, %v991_v6  ;;  %v1000_v39 = vsel %vm887_vm5, %v1859_v8, 0.0 }
 0x2b6   : > { %v1863_v20 = vpop.eup %1862  ;;  %1664 = vmatprep.subr.bf16.mxu1 %v1663_v5  ;;  %v1671_v22 = vpack.c.bf16 %v1861_v16, %v1859_v8  ;;  %v1002_v41 = vsel %vm887_vm5, %v1861_v16, 0.0  ;;  %v1052_v61 = vpop.trf.xlu0  ;;  %v1205_v8 = vld [vmem:[#allocation4 + $0x18] sm:$0xff]  ;;  %v1204_v16 = vld [vmem:[#allocation4 + $0x10] sm:$0xff] }
 0x2b7   : > { %v1865_v23 = vpop.eup %1864  ;;  %v995_v24 = vadd.f32 %v994_v21, %v993_v19  ;;  %v1004_v59 = vsel %vm887_vm5, %v1863_v20, 0.0 }
 0x2b8   : > { %v1867_v25 = vpop.eup %1866  ;;  %v1675_v32 = vpack.c.bf16 %v1865_v23, %v1863_v20  ;;  %v1006_v46 = vsel %vm887_vm5, %v1865_v23, 0.0  ;;  %v1207_v23 = vld [vmem:[#allocation4 + $0x28] sm:$0xff] }
 0x2b9   : > { %v1869_v33 = vpop.eup %1868  ;;  %1666 = vmatpush3.bf16.msra.mxu1 %v1663_v5  ;;  %v997_v35 = vadd.f32 %v996_v27, %v995_v24  ;;  %v1008_v29 = vsel %vm887_vm5, %v1867_v25, 0.0  ;;  %v1202_v5 = vld [vmem:[#allocation4] sm:$0xff] }
 0x2ba   : > { %v1871_v38 = vpop.eup %1870  ;;  %1668 = vmatprep.subr.bf16.mxu1 %v1667_v14  ;;  %v1679_v30 = vpack.c.bf16 %v1869_v33, %v1867_v25  ;;  %v1010_v31 = vsel %vm887_vm5, %v1869_v33, 0.0  ;;  %v1053_v12 = vpop.trf.xlu0  ;;  %v1206_v27 = vld [vmem:[#allocation4 + $0x20] sm:$0xff] }
 0x2bb   : > { %v999_v53 = vadd.f32 %v998_v34, %v997_v35  ;;  %v1683_v44 = vpack.c.bf16 %v1871_v38, %v2433_v51  ;;  %v1014_v17 = vsel %vm887_vm5, %v1871_v38, 0.0  ;;  %v1873_v0 = vpop.eup %1872  ;;  %v983_v51 = vld [vmem:[#allocation3] sm:$0x1] }
 0x2bc   : > { %v984_v2 = vmul.f32 %v1873_v0, %v983_v51  ;;  %v1209_v38 = vld [vmem:[#allocation4 + $0x38] sm:$0xff] }
 0x2bd   : > { %1670 = vmatpush3.bf16.msra.mxu1 %v1667_v14  ;;  %v1001_v57 = vadd.f32 %v1000_v39, %v999_v53  ;;  %v1208_v53 = vld [vmem:[#allocation4 + $0x30] sm:$0xff]  ;;  %v1217_v51 = vld [vmem:[#allocation4 + $0x78] sm:$0xff] }
 0x2be   : > { %1672 = vmatprep.subr.bf16.mxu1 %v1671_v22 }
 0x2bf   : > { %v1003_v62 = vadd.f32 %v1002_v41, %v1001_v57 }
 0x2c1   : > { %1674 = vmatpush3.bf16.msra.mxu1 %v1671_v22  ;;  %v1005_v45 = vadd.f32 %v1004_v59, %v1003_v62  ;;  %v1211_v62 = vld [vmem:[#allocation4 + $0x48] sm:$0xff] }
 0x2c2   : > { %1676 = vmatprep.subr.bf16.mxu1 %v1675_v32 }
 0x2c3   : > { %v1007_v10 = vadd.f32 %v1006_v46, %v1005_v45  ;;  %v1210_v45 = vld [vmem:[#allocation4 + $0x40] sm:$0xff] }
 0x2c5   : > { %1678 = vmatpush3.bf16.msra.mxu1 %v1675_v32  ;;  %v1009_v26 = vadd.f32 %v1008_v29, %v1007_v10 }
 0x2c6   : > { %1680 = vmatprep.subr.bf16.mxu1 %v1679_v30 }
 0x2c7   : > { %v1011_v48 = vadd.f32 %v1010_v31, %v1009_v26  ;;  %v1213_v26 = vld [vmem:[#allocation4 + $0x58] sm:$0xff]  ;;  %v1212_v31 = vld [vmem:[#allocation4 + $0x50] sm:$0xff] }
 0x2c9   : > { %v1013_v54 = vadd.f32 %v1012_v52, %v1011_v48  ;;  %1682 = vmatpush3.bf16.msra.mxu1 %v1679_v30 }
 0x2ca   : > { %1684 = vmatprep.subr.bf16.mxu1 %v1683_v44 }
 0x2cb   : > { %v1015_v15 = vadd.f32 %v1014_v17, %v1013_v54 }
 0x2cd   : > { %v1016_v28 = vrot.slane %v1015_v15, 4  ;;  %1686 = vmatpush3.bf16.msra.mxu1 %v1683_v44 }
 0x2cf   : > { %v1017_v58 = vadd.f32 %v1016_v28, %v1015_v15  ;;  %v1215_v15 = vld [vmem:[#allocation4 + $0x68] sm:$0xff] }
 0x2d0   : > { %1568 = vmatmul.mubr.f32.vlgmr.msra.gmra.mrb[16].mxu1 %v2401_v11  ;;  %v1054_v11 = vpop.trf.xlu0 }
 0x2d1   : > { %v1018_v60 = vrot.slane %v1017_v58, 2  ;;  %1570 = vmatprep.mubr.f32.mxu1 %v2412_v18 }
 0x2d3   : > { %v1019_v63 = vadd.f32 %v1018_v60, %v1017_v58  ;;  %v1214_v58 = vld [vmem:[#allocation4 + $0x60] sm:$0xff] }
 0x2d4   : > { %1571 = vmatmul.mubr.f32.gmra.mrb[18].mxu1 %v2422_v40  ;;  %v1055_v18 = vpop.trf.xlu0 }
 0x2d5   : > { %v1020_v1 = vrot.slane %v1019_v63, 1  ;;  %1573 = vmatprep.mubr.f32.mxu1 %v2431_v47  ;;  %v2467_v47 = vrot.slane %v1873_v0, %v2248_v37 }
 0x2d7   : > { %v1021_v3 = vadd.f32 %v1020_v1, %v1019_v63  ;;  %v1227_v20 = vmul.f32 %v2467_v47, %v1205_v8  ;;  %v1226_v22 = vmul.f32 %v2467_v47, %v1204_v16  ;;  %v1229_v33 = vmul.f32 %v2467_v47, %v1207_v23 }
 0x2d8   : > { %1574 = vmatmul.mubr.f32.gmra.mrb[20].mxu1 %v2436_v55  ;;  %v1056_v40 = vpop.trf.xlu0  ;;  %v1203_v55 = vld [vmem:[#allocation4 + $0x8] sm:$0xff]  ;;  %v1231_v39 = vmul.f32 %v2467_v47, %v1209_v38  ;;  %v1230_v41 = vmul.f32 %v2467_v47, %v1208_v53  ;;  %v1233_v46 = vmul.f32 %v2467_v47, %v1211_v62  ;;  %v1232_v29 = vmul.f32 %v2467_v47, %v1210_v45 }
 0x2d9   : > { %v1022_v4 = vadd.f32 %v1021_v3, %v984_v2  ;;  %1576 = vmatprep.mubr.f32.mxu1 %v2441_v7  ;;  %v1225_v42 = vmul.f32 %v2467_v47, %v1203_v55  ;;  %v1224_v7 = vmul.f32 %v2467_v47, %v1202_v5  ;;  %v1235_v52 = vmul.f32 %v2467_v47, %v1213_v26  ;;  %v1216_v3 = vld [vmem:[#allocation4 + $0x70] sm:$0xff] }
 0x2da   : > { %v1234_v17 = vmul.f32 %v2467_v47, %v1212_v31  ;;  %v1236_v0 = vmul.f32 %v2467_v47, %v1214_v58 }
 0x2db   : > { %1024 = vst.msk [vmem:[#allocation3] sm:$0x1] %vm1023_vm3, %v1022_v4  ;;  %v1239_v4 = vmul.f32 %v2467_v47, %v1217_v51 }
 0x2dc   : > { %1577 = vmatmul.mubr.f32.gmra.mrb[22].mxu1 %v1048_v36  ;;  %v1228_v36 = vmul.f32 %v2467_v47, %v1206_v27 }
 0x2dd   : > { %1579 = vmatprep.mubr.f32.mxu1 %v1049_v43 }
 0x2e0   : > { %1580 = vmatmul.mubr.f32.gmra.mrb[24].mxu1 %v1050_v49 }
 0x2e1   : > { %1582 = vmatprep.mubr.f32.mxu1 %v1051_v56 }
 0x2e4   : > { %1583 = vmatmul.mubr.f32.gmra.mrb[26].mxu1 %v1052_v61  ;;  %v1237_v61 = vmul.f32 %v2467_v47, %v1215_v15 }
 0x2e5   : > { %1585 = vmatprep.mubr.f32.mxu1 %v1053_v12 }
 0x2e8   : > { %1586 = vmatmul.mubr.f32.gmra.mrb[28].mxu1 %v1054_v11 }
 0x2e9   : > { %1588 = vmatprep.mubr.f32.mxu1 %v1055_v18  ;;  %v1238_v18 = vmul.f32 %v2467_v47, %v1216_v3 }
 0x2ec   : > { %1589 = vmatmul.mubr.f32.gmra.mrb[30].mxu1 %v1056_v40 }
 0x3a3   : > { %v1569_v6 = vpop.f32.mrb[16].mxu1 }
 0x3a4   : > { %v1241_v9 = vadd.f32 %v1569_v6, %v1225_v42  ;;  %v1123_v14 = vpop.f32.mrb[17].mxu1  ;;  %v1277_v42 = vld [vmem:[#allocation3] sm:$0x1] (!%p1411_p9) }
 0x3a5   : > { %v1240_v19 = vadd.f32 %v1224_v7, %v1123_v14  ;;  %1874 = vrcp.f32 (!%p1411_p9), %v1277_v42 }
 0x3a6   : > { %1257 = vst.msk [vmem:[#allocation4 + $0x8] sm:$0xff] %vm887_vm5, %v1241_v9 }
 0x3a7   : > { %1256 = vst.msk [vmem:[#allocation4] sm:$0xff] %vm887_vm5, %v1240_v19  ;;  %v1572_v21 = vpop.f32.mrb[18].mxu1 }
 0x3a8   : > { %v1243_v24 = vadd.f32 %v1572_v21, %v1227_v20  ;;  %v1133_v25 = vpop.f32.mrb[19].mxu1 }
 0x3a9   : > { %v1242_v32 = vadd.f32 %v1226_v22, %v1133_v25 }
 0x3aa   : > { %1259 = vst.msk [vmem:[#allocation4 + $0x18] sm:$0xff] %vm887_vm5, %v1243_v24 }
 0x3ab   : > { %1258 = vst.msk [vmem:[#allocation4 + $0x10] sm:$0xff] %vm887_vm5, %v1242_v32  ;;  %v1575_v35 = vpop.f32.mrb[20].mxu1 }
 0x3ac   : > { %v1245_v34 = vadd.f32 %v1575_v35, %v1229_v33  ;;  %v1143_v30 = vpop.f32.mrb[21].mxu1 }
 0x3ad   : > { %v1244_v44 = vadd.f32 %v1228_v36, %v1143_v30  ;;  %v1280_v7 = vld [vmem:[#allocation4 + $0x8] sm:$0xff] (!%p1411_p9) }
 0x3ae   : > { %1261 = vst.msk [vmem:[#allocation4 + $0x28] sm:$0xff] %vm887_vm5, %v1245_v34  ;;  %v1279_v6 = vld [vmem:[#allocation4] sm:$0xff] (!%p1411_p9) }
 0x3af   : > { %1260 = vst.msk [vmem:[#allocation4 + $0x20] sm:$0xff] %vm887_vm5, %v1244_v44  ;;  %v1578_v57 = vpop.f32.mrb[22].mxu1  ;;  %v1875_v14 = vpop.eup (!%p1411_p9), %1874 }
 0x3b0   : > { %v1247_v43 = vadd.f32 %v1578_v57, %v1231_v39  ;;  %v1153_v59 = vpop.f32.mrb[23].mxu1  ;;  %v1299_v20 = vrot.slane (!%p1411_p9), %v1875_v14, %v2248_v37 }
 0x3b1   : > { %v1246_v13 = vadd.f32 %v1230_v41, %v1153_v59  ;;  %v1282_v9 = vld [vmem:[#allocation4 + $0x18] sm:$0xff] (!%p1411_p9) }
 0x3b2   : > { %1263 = vst.msk [vmem:[#allocation4 + $0x38] sm:$0xff] %vm887_vm5, %v1247_v43  ;;  %v1281_v8 = vld [vmem:[#allocation4 + $0x10] sm:$0xff] (!%p1411_p9)  ;;  %v1301_v32 = vmul.f32 (!%p1411_p9), %v1299_v20, %v1279_v6  ;;  %v1302_v33 = vmul.f32 (!%p1411_p9), %v1299_v20, %v1280_v7  ;;  %v1304_v36 = vmul.f32 (!%p1411_p9), %v1299_v20, %v1282_v9 }
 0x3b3   : > { %1262 = vst.msk [vmem:[#allocation4 + $0x30] sm:$0xff] %vm887_vm5, %v1246_v13  ;;  %v1581_v10 = vpop.f32.mrb[24].mxu1  ;;  %v1303_v35 = vmul.f32 (!%p1411_p9), %v1299_v20, %v1281_v8 }
 0x3b4   : > { %v1249_v49 = vadd.f32 %v1581_v10, %v1233_v46  ;;  %v1163_v50 = vpop.f32.mrb[25].mxu1  ;;  %1317 = vst.msk [vmem:[%s2585_s5] sm:$0xff] (!%p1411_p9), %vm887_vm5, %v1301_v32  ;;  %1318 = vst.msk [vmem:[%s2585_s5 + $0x8] sm:$0xff] (!%p1411_p9), %vm887_vm5, %v1302_v33 }
 0x3b5   : > { %v1248_v48 = vadd.f32 %v1232_v29, %v1163_v50  ;;  %v1284_v19 = vld [vmem:[#allocation4 + $0x28] sm:$0xff] (!%p1411_p9)  ;;  %1319 = vst.msk [vmem:[%s2585_s5 + $0x10] sm:$0xff] (!%p1411_p9), %vm887_vm5, %v1303_v35  ;;  %1320 = vst.msk [vmem:[%s2585_s5 + $0x18] sm:$0xff] (!%p1411_p9), %vm887_vm5, %v1304_v36 }
 0x3b6   : > { %1265 = vst.msk [vmem:[#allocation4 + $0x48] sm:$0xff] %vm887_vm5, %v1249_v49  ;;  %v1283_v16 = vld [vmem:[#allocation4 + $0x20] sm:$0xff] (!%p1411_p9)  ;;  %v1306_v44 = vmul.f32 (!%p1411_p9), %v1299_v20, %v1284_v19 }
 0x3b7   : > { %1264 = vst.msk [vmem:[#allocation4 + $0x40] sm:$0xff] %vm887_vm5, %v1248_v48  ;;  %v1584_v54 = vpop.f32.mrb[26].mxu1  ;;  %v1305_v53 = vmul.f32 (!%p1411_p9), %v1299_v20, %v1283_v16 }
 0x3b8   : > { %v1251_v56 = vadd.f32 %v1584_v54, %v1235_v52  ;;  %v1173_v28 = vpop.f32.mrb[27].mxu1  ;;  %1322 = vst.msk [vmem:[%s2585_s5 + $0x28] sm:$0xff] (!%p1411_p9), %vm887_vm5, %v1306_v44 }
 0x3b9   : > { %v1250_v60 = vadd.f32 %v1234_v17, %v1173_v28  ;;  %v1286_v21 = vld [vmem:[#allocation4 + $0x38] sm:$0xff] (!%p1411_p9)  ;;  %1321 = vst.msk [vmem:[%s2585_s5 + $0x20] sm:$0xff] (!%p1411_p9), %vm887_vm5, %v1305_v53 }
 0x3ba   : > { %1267 = vst.msk [vmem:[#allocation4 + $0x58] sm:$0xff] %vm887_vm5, %v1251_v56  ;;  %v1285_v47 = vld [vmem:[#allocation4 + $0x30] sm:$0xff] (!%p1411_p9)  ;;  %v1308_v57 = vmul.f32 (!%p1411_p9), %v1299_v20, %v1286_v21 }
 0x3bb   : > { %1266 = vst.msk [vmem:[#allocation4 + $0x50] sm:$0xff] %vm887_vm5, %v1250_v60  ;;  %v1587_v63 = vpop.f32.mrb[28].mxu1  ;;  %v1307_v39 = vmul.f32 (!%p1411_p9), %v1299_v20, %v1285_v47 }
 0x3bc   : > { %v1253_v1 = vadd.f32 %v1587_v63, %v1237_v61  ;;  %v1183_v2 = vpop.f32.mrb[29].mxu1  ;;  %1324 = vst.msk [vmem:[%s2585_s5 + $0x38] sm:$0xff] (!%p1411_p9), %vm887_vm5, %v1308_v57 }
 0x3bd   : > { %v1252_v12 = vadd.f32 %v1236_v0, %v1183_v2  ;;  %1276 = sbr.rel (%p1411_p9) target bundleno = 974 (0x3ce), region = 56  ;;  %v1288_v23 = vld [vmem:[#allocation4 + $0x48] sm:$0xff] (!%p1411_p9)  ;;  %1323 = vst.msk [vmem:[%s2585_s5 + $0x30] sm:$0xff] (!%p1411_p9), %vm887_vm5, %v1307_v39 }
 0x3be   : > { %1269 = vst.msk [vmem:[#allocation4 + $0x68] sm:$0xff] %vm887_vm5, %v1253_v1  ;;  %v1287_v22 = vld [vmem:[#allocation4 + $0x40] sm:$0xff] (!%p1411_p9)  ;;  %v1310_v41 = vmul.f32 (!%p1411_p9), %v1299_v20, %v1288_v23 }
 0x3bf   : > { %1268 = vst.msk [vmem:[#allocation4 + $0x60] sm:$0xff] %vm887_vm5, %v1252_v12  ;;  %v1590_v11 = vpop.f32.mrb[30].mxu1  ;;  %v1309_v37 = vmul.f32 (!%p1411_p9), %v1299_v20, %v1287_v22 }
 0x3c0   : > { %v1255_v40 = vadd.f32 %v1590_v11, %v1239_v4  ;;  %v1193_v55 = vpop.f32.mrb[31].mxu1  ;;  %1326 = vst.msk [vmem:[%s2585_s5 + $0x48] sm:$0xff] (!%p1411_p9), %vm887_vm5, %v1310_v41 }
 0x3c1   : > { %v1254_v5 = vadd.f32 %v1238_v18, %v1193_v55  ;;  %v1290_v25 = vld [vmem:[#allocation4 + $0x58] sm:$0xff] (!%p1411_p9)  ;;  %1325 = vst.msk [vmem:[%s2585_s5 + $0x40] sm:$0xff] (!%p1411_p9), %vm887_vm5, %v1309_v37 }
 0x3c2   : > { %1271 = vst.msk [vmem:[#allocation4 + $0x78] sm:$0xff] %vm887_vm5, %v1255_v40  ;;  %v1289_v24 = vld [vmem:[#allocation4 + $0x50] sm:$0xff] (!%p1411_p9)  ;;  %v1312_v43 = vmul.f32 (!%p1411_p9), %v1299_v20, %v1290_v25 }
 0x3c3   : > { %1270 = vst.msk [vmem:[#allocation4 + $0x70] sm:$0xff] %vm887_vm5, %v1254_v5  ;;  %v1311_v62 = vmul.f32 (!%p1411_p9), %v1299_v20, %v1289_v24 }
 0x3c4   : > { %1328 = vst.msk [vmem:[%s2585_s5 + $0x58] sm:$0xff] %vm887_vm5, %v1312_v43 }
 0x3c5   : > { %v1292_v38 = vld [vmem:[#allocation4 + $0x68] sm:$0xff]  ;;  %1327 = vst.msk [vmem:[%s2585_s5 + $0x50] sm:$0xff] %vm887_vm5, %v1311_v62 }
 0x3c6   : > { %v1291_v27 = vld [vmem:[#allocation4 + $0x60] sm:$0xff]  ;;  %v1314_v45 = vmul.f32 %v1299_v20, %v1292_v38 }
 0x3c7   : > { %v1313_v59 = vmul.f32 %v1299_v20, %v1291_v27 }
 0x3c8   : > { %1330 = vst.msk [vmem:[%s2585_s5 + $0x68] sm:$0xff] %vm887_vm5, %v1314_v45 }
 0x3c9   : > { %v1294_v30 = vld [vmem:[#allocation4 + $0x78] sm:$0xff]  ;;  %1329 = vst.msk [vmem:[%s2585_s5 + $0x60] sm:$0xff] %vm887_vm5, %v1313_v59 }
 0x3ca   : > { %v1293_v34 = vld [vmem:[#allocation4 + $0x70] sm:$0xff]  ;;  %v1316_v46 = vmul.f32 %v1299_v20, %v1294_v30 }
 0x3cb   : > { %v1315_v13 = vmul.f32 %v1299_v20, %v1293_v34 }
 0x3cc   : > { %1332 = vst.msk [vmem:[%s2585_s5 + $0x78] sm:$0xff] %vm887_vm5, %v1316_v46 }
 0x3cd   : > { %1331 = vst.msk [vmem:[%s2585_s5 + $0x70] sm:$0xff] %vm887_vm5, %v1315_v13 }
 0x3ce PF: > { %s2598_s13 = smov %s2084_s18  ;;  %p16_p10 = scmp.ge.s32.totalorder %s2058_s28, 4  }
 0x3cf   : > { %s2599_s18 = smov %s1964_s19  ;;  %s2600_s19 = smov %s1968_s20 }
 0x3d0   : > { %s2601_s20 = smov %s2598_s13  ;;  %s2602_s21 = smov %s2058_s28 }
 0x3d1   :  { %18 = sbr.rel (!%p16_p10) target bundleno = 4 (0x4), region = 88 }
 0x3d8   :  { %1344 = vsyncpa [#allocation6], 1 }
 0x3d9   :  { %1346 = vsyncpa [#allocation6 + $0x1], 1 }
 0x3da   :  { %1347 = vsyncpa [#allocation8], 1 }

</bundles_post_ra>
